<compile_context>
chip_gen: v5e
topology: v5e:2x2
jax: 0.10.0
libtpu: 0.0.40
codegen_flags: <defaults>
</compile_context>

<pallas_src>
import math

import jax
import jax.numpy as jnp
from jax.experimental import pallas as pl
from jax.experimental.pallas import tpu as pltpu

LN_EPS = 1e-5  # torch.nn.LayerNorm default


def _make_mha_kernel(Bt, S, H, nh):
    # dot_product_attention scales by sqrt(d_k); here the per-head dim IS the
    # hidden size (each head gets a full H-wide projection), so 1/sqrt(H).
    scale = 1.0 / math.sqrt(H)

    def kernel(x_ref, g_ref, b_ref, wqkv_ref, bqkv_ref, wp_ref, bp_ref,
               out_ref, attn_ref):
        x = x_ref[...].astype(jnp.float32)                       # (Bt, S, H)

        # ---- LayerNorm in f32 (once per row; shared by all heads) ----------
        mu = jnp.mean(x, axis=-1, keepdims=True)
        var = jnp.mean((x - mu) ** 2, axis=-1, keepdims=True)
        xn = (x - mu) * jax.lax.rsqrt(var + LN_EPS)
        xn = xn * g_ref[...] + b_ref[...]                        # (Bt, S, H)
        xn2 = xn.reshape(Bt * S, H).astype(jnp.bfloat16)         # shared MXU LHS

        # ---- Per-head attention + accumulated output projection ------------
        # Weights are pre-split per head: only leading-axis indexing, no
        # lane-dim slicing / concatenation.  nh is small -> static unroll.
        # (For large nh switch to lax.fori_loop(..., unroll=...) so live
        #  ranges stay bounded.)
        acc = jnp.zeros((Bt * S, H), jnp.float32)
        for h in range(nh):
            q_h = (jnp.dot(xn2, wqkv_ref[0, h],
                           preferred_element_type=jnp.float32) + bqkv_ref[0, h])
            k_h = (jnp.dot(xn2, wqkv_ref[1, h],
                           preferred_element_type=jnp.float32) + bqkv_ref[1, h])
            v_h = (jnp.dot(xn2, wqkv_ref[2, h],
                           preferred_element_type=jnp.float32) + bqkv_ref[2, h])
            q3 = q_h.reshape(Bt, S, H).astype(jnp.bfloat16)
            k3 = k_h.reshape(Bt, S, H).astype(jnp.bfloat16)
            v3 = v_h.reshape(Bt, S, H).astype(jnp.bfloat16)

            s = jnp.einsum('bqd,bkd->bqk', q3, k3,
                           preferred_element_type=jnp.float32) * scale
            # TODO(synk): mask path not implemented (forward is used with mask=None).
            s = s - jnp.max(s, axis=-1, keepdims=True)
            e = jnp.exp(s)
            # Exact reciprocal (correctness feedback): rows sum to 1 at f32
            # precision before the bf16 store; negligible cost on (Bt, S, 1).
            inv = pl.reciprocal(jnp.sum(e, axis=-1, keepdims=True), approx=False)
            p = e * inv                                          # (Bt, S, S) f32
            attn_ref[h] = p.astype(attn_ref.dtype)               # bf16 writeback

            ctx = jnp.einsum('bqk,bkd->bqd', p.astype(jnp.bfloat16), v3,
                             preferred_element_type=jnp.float32)  # (Bt, S, H)
            # Output projection accumulated per head -> no head concat buffer.
            acc = acc + jnp.dot(ctx.reshape(Bt * S, H).astype(jnp.bfloat16),
                                wp_ref[h], preferred_element_type=jnp.float32)

        # ---- Bias, residual -------------------------------------------------
        # TODO(synk): dropout is identity here (eval mode / p=0).
        r = acc + bp_ref[...]
        out_ref[...] = (r.reshape(Bt, S, H) + x).astype(out_ref.dtype)

    return kernel


def _vmem_bytes_estimate(Bt, S, H, nh):
    """Rough per-grid-step VMEM footprint (pipeline buffers + working set)."""
    f32, bf16 = 4, 2
    rows = Bt * S
    io = 2 * (2 * Bt * S * H * f32)               # x in + out blocks, double-buffered
    attn = 2 * (nh * Bt * S * S * bf16)           # attn out block, double-buffered
    weights = (3 * nh + nh) * H * H * bf16        # Wqkv + Wproc (single-buffered)
    biases = (3 * nh * H + 3 * H) * f32
    work = rows * H * (4 * f32 + 4 * bf16) + 3 * Bt * S * S * f32
    return io + attn + weights + biases + work


def _pick_batch_tile(B, S, H, nh, target_rows=512, vmem_budget=24 << 20):
    """Largest divisor Bt of B s.t. Bt*S <= target_rows (MXU M target), the
    per-step working set fits the VMEM budget, and the grid has >= 2 steps
    whenever B >= 2 (so a 'parallel' grid axis can feed both v7x TCs)."""
    best = 1
    for bt in range(1, B + 1):
        if B % bt:
            continue
        if bt > 1 and bt * S > target_rows:
            continue
        if B >= 2 and B // bt < 2:
            continue
        if _vmem_bytes_estimate(bt, S, H, nh) > vmem_budget:
            continue
        best = bt
    return best


def mha_forward(x, params):
    B, S, H = x.shape
    nh = params["num_heads"]
    Bt = _pick_batch_tile(B, S, H, nh)
    grid = (B // Bt,)

    f32, bf16 = jnp.float32, jnp.bfloat16

    # torch Linear: y = x @ W.T + b with W: (nh*H, H).  Pre-split per head so
    # the kernel never slices the lane dimension: head h uses W[h*H:(h+1)*H].T.
    def split_heads(w):                           # (nh*H, H) -> (nh, H, H)
        return w.reshape(nh, H, H).transpose(0, 2, 1)

    w_qkv = jnp.stack([split_heads(params["wq"]),
                       split_heads(params["wk"]),
                       split_heads(params["wv"])], axis=0).astype(bf16)    # (3,nh,H,H)
    b_qkv = jnp.stack([params["bq"].reshape(nh, 1, H),
                       params["bk"].reshape(nh, 1, H),
                       params["bv"].reshape(nh, 1, H)], axis=0).astype(f32)  # (3,nh,1,H)
    # proc: y = o @ Wp.T with Wp: (H, nh*H); per-head slab Wp.T[h*H:(h+1)*H, :].
    wp_split = params["wp"].T.reshape(nh, H, H).astype(bf16)               # (nh,H,H)
    bp = params["bp"].reshape(1, H).astype(f32)
    ln_g = params["ln_g"].reshape(1, H).astype(f32)
    ln_b = params["ln_b"].reshape(1, H).astype(f32)

    kernel = _make_mha_kernel(Bt, S, H, nh)
    vmem_limit = int(min(32 << 20,
                         max(16 << 20, 6 * _vmem_bytes_estimate(Bt, S, H, nh))))

    def build(single_buffer_invariants):
        def inv(shape):
            kw = {}
            if single_buffer_invariants:
                # Grid-invariant blocks: double-buffering buys no overlap,
                # only VMEM footprint.
                kw["pipeline_mode"] = pl.Buffered(1)
            return pl.BlockSpec(shape, lambda b: (0,) * len(shape), **kw)

        return pl.pallas_call(
            kernel,
            out_shape=(jax.ShapeDtypeStruct((B, S, H), x.dtype),
                       jax.ShapeDtypeStruct((nh, B, S, S), jnp.bfloat16)),
            grid=grid,
            in_specs=[
                pl.BlockSpec((Bt, S, H), lambda b: (b, 0, 0)),        # x
                inv((1, H)),                                          # ln gamma
                inv((1, H)),                                          # ln beta
                inv((3, nh, H, H)),                                   # W_{q,k,v} per head
                inv((3, nh, 1, H)),                                   # b_{q,k,v} per head
                inv((nh, H, H)),                                      # W_proc per head
                inv((1, H)),                                          # b_proc
            ],
            out_specs=(
                pl.BlockSpec((Bt, S, H), lambda b: (b, 0, 0)),        # result
                pl.BlockSpec((nh, Bt, S, S), lambda b: (0, b, 0, 0)), # attn (bf16)
            ),
            compiler_params=pltpu.CompilerParams(
                dimension_semantics=("parallel",),   # batch blocks independent
                vmem_limit_bytes=vmem_limit),
        )

    args = (x, ln_g, ln_b, w_qkv, b_qkv, wp_split, bp)
    try:
        out, attn4 = build(True)(*args)
    except Exception:
        # pl.Buffered(1) pipeline hint unsupported on this jax build; the
        # fallback differs only in buffering, so real errors still surface.
        out, attn4 = build(False)(*args)

    # (nh, B, S, S) -> (nh*B, S, S): head-major leading axis, same as torch ref.
    return out, attn4.reshape(nh * B, S, S)


# ---------------------------------------------------------------------------
# Pure-JAX reference (mirrors the PyTorch module, f32 everywhere).
# ---------------------------------------------------------------------------
def mha_reference(x, params):
    B, S, H = x.shape
    nh = params["num_heads"]
    mu = jnp.mean(x, axis=-1, keepdims=True)
    var = jnp.mean((x - mu) ** 2, axis=-1, keepdims=True)
    xn = (x - mu) / jnp.sqrt(var + LN_EPS) * params["ln_g"] + params["ln_b"]

    def prepare(w, b):
        y = xn @ w.T + b                                        # (B, S, nh*H)
        return y.reshape(B, S, nh, H).transpose(2, 0, 1, 3).reshape(nh * B, S, H)

    q = prepare(params["wq"], params["bq"])
    k = prepare(params["wk"], params["bk"])
    v = prepare(params["wv"], params["bv"])
    s = jnp.einsum('nqd,nkd->nqk', q, k) / math.sqrt(H)
    attn = jax.nn.softmax(s, axis=-1)
    o = jnp.einsum('nqk,nkd->nqd', attn, v)
    o = o.reshape(nh, B, S, H).transpose(1, 2, 0, 3).reshape(B, S, nh * H)
    out = o @ params["wp"].T + params["bp"] + x
    return out, attn


def init_params(key, hidden_size, num_heads):
    H, nh = hidden_size, num_heads
    ks = jax.random.split(key, 8)
    std = math.sqrt(1.0 / H)
    xav = math.sqrt(2.0 / (H + nh * H))
    return {
        "num_heads": nh,
        "ln_g": jnp.ones((H,), jnp.float32),
        "ln_b": jnp.zeros((H,), jnp.float32),
        "wq": std * jax.random.normal(ks[0], (nh * H, H), jnp.float32),
        "bq": 0.01 * jax.random.normal(ks[1], (nh * H,), jnp.float32),
        "wk": std * jax.random.normal(ks[2], (nh * H, H), jnp.float32),
        "bk": 0.01 * jax.random.normal(ks[3], (nh * H,), jnp.float32),
        "wv": std * jax.random.normal(ks[4], (nh * H, H), jnp.float32),
        "bv": 0.01 * jax.random.normal(ks[5], (nh * H,), jnp.float32),
        "wp": xav * jax.random.normal(ks[6], (H, nh * H), jnp.float32),
        "bp": 0.01 * jax.random.normal(ks[7], (H,), jnp.float32),
    }


if __name__ == "__main__":
    B, S, H, nh = 2, 8, 32, 2
    key = jax.random.PRNGKey(0)
    k_x, k_p = jax.random.split(key)
    x = jax.random.normal(k_x, (B, S, H), jnp.float32)
    params = init_params(k_p, H, nh)

    out, attn = jax.block_until_ready(mha_forward(x, params))
    out_ref, attn_ref = mha_reference(x, params)

    attn_f32 = attn.astype(jnp.float32)
    assert out.shape == (B, S, H)
    assert attn.shape == (nh * B, S, S)
    assert bool(jnp.all(jnp.isfinite(out))) and bool(jnp.all(jnp.isfinite(attn_f32)))
    # softmax rows sum to ~1 (exact reciprocal; bf16 storage -> ~1e-3 rounding)
    assert bool(jnp.allclose(jnp.sum(attn_f32, axis=-1), 1.0, atol=1e-2))
    # match the f32 reference within bf16-matmul tolerance
    assert bool(jnp.allclose(attn_f32, attn_ref, atol=3e-2))
    assert bool(jnp.allclose(out, out_ref, atol=1e-1, rtol=1e-1))

    print("KERNEL_OK")
</pallas_src>

<mosaic_0001>
module attributes {stable_mosaic.version = 11 : i64} {
  func.func @kernel(%arg0: i32, %arg1: memref<1x8x32xf32, #tpu.memory_space<vmem>>, %arg2: memref<1x32xf32, #tpu.memory_space<vmem>>, %arg3: memref<1x32xf32, #tpu.memory_space<vmem>>, %arg4: memref<3x2x32x32xbf16, #tpu.memory_space<vmem>>, %arg5: memref<3x2x1x32xf32, #tpu.memory_space<vmem>>, %arg6: memref<2x32x32xbf16, #tpu.memory_space<vmem>>, %arg7: memref<1x32xf32, #tpu.memory_space<vmem>>, %arg8: memref<1x8x32xf32, #tpu.memory_space<vmem>>, %arg9: memref<2x1x8x8xbf16, #tpu.memory_space<vmem>>) attributes {dimension_semantics = [#tpu.dimension_semantics<parallel>], iteration_bounds = array<i64: 2>, scalar_prefetch = 0 : i64, scratch_operands = 0 : i64, tpu.core_type = #tpu.core_type<tc>, window_params = [{transform_indices = @transform_0, window_bounds = array<i64: 1, 8, 32>}, {pipeline_mode = #tpu.pipeline_mode<synchronous>, transform_indices = @transform_1, window_bounds = array<i64: 1, 32>}, {pipeline_mode = #tpu.pipeline_mode<synchronous>, transform_indices = @transform_2, window_bounds = array<i64: 1, 32>}, {pipeline_mode = #tpu.pipeline_mode<synchronous>, transform_indices = @transform_3, window_bounds = array<i64: 3, 2, 32, 32>}, {pipeline_mode = #tpu.pipeline_mode<synchronous>, transform_indices = @transform_4, window_bounds = array<i64: 3, 2, 1, 32>}, {pipeline_mode = #tpu.pipeline_mode<synchronous>, transform_indices = @transform_5, window_bounds = array<i64: 2, 32, 32>}, {pipeline_mode = #tpu.pipeline_mode<synchronous>, transform_indices = @transform_6, window_bounds = array<i64: 1, 32>}, {transform_indices = @transform_7, window_bounds = array<i64: 1, 8, 32>}, {transform_indices = @transform_8, window_bounds = array<i64: 2, 1, 8, 8>}]} {
    %c0 = arith.constant 0 : index
    %c0_0 = arith.constant 0 : index
    %c0_1 = arith.constant 0 : index
    %0 = vector.load %arg1[%c0, %c0_0, %c0_1] : memref<1x8x32xf32, #tpu.memory_space<vmem>>, vector<1x8x32xf32>
    %cst = arith.constant dense<0.000000e+00> : vector<1x8xf32>
    %1 = vector.multi_reduction <add>, %0, %cst [2] : vector<1x8x32xf32> to vector<1x8xf32>
    %2 = vector.shape_cast %1 : vector<1x8xf32> to vector<1x8x1xf32>
    %cst_2 = arith.constant 3.200000e+01 : f32
    %3 = vector.broadcast %cst_2 : f32 to vector<1x8x1xf32>
    %4 = arith.divf %2, %3 : vector<1x8x1xf32>
    %5 = vector.broadcast %4 : vector<1x8x1xf32> to vector<1x8x32xf32>
    %6 = arith.subf %0, %5 : vector<1x8x32xf32>
    %7 = arith.mulf %6, %6 : vector<1x8x32xf32>
    %cst_3 = arith.constant dense<0.000000e+00> : vector<1x8xf32>
    %8 = vector.multi_reduction <add>, %7, %cst_3 [2] : vector<1x8x32xf32> to vector<1x8xf32>
    %9 = vector.shape_cast %8 : vector<1x8xf32> to vector<1x8x1xf32>
    %cst_4 = arith.constant 3.200000e+01 : f32
    %10 = vector.broadcast %cst_4 : f32 to vector<1x8x1xf32>
    %11 = arith.divf %9, %10 : vector<1x8x1xf32>
    %12 = vector.broadcast %4 : vector<1x8x1xf32> to vector<1x8x32xf32>
    %13 = arith.subf %0, %12 : vector<1x8x32xf32>
    %cst_5 = arith.constant 9.99999974E-6 : f32
    %14 = vector.broadcast %cst_5 : f32 to vector<1x8x1xf32>
    %15 = arith.addf %11, %14 : vector<1x8x1xf32>
    %16 = math.rsqrt %15 : vector<1x8x1xf32>
    %17 = vector.broadcast %16 : vector<1x8x1xf32> to vector<1x8x32xf32>
    %18 = arith.mulf %13, %17 : vector<1x8x32xf32>
    %c0_6 = arith.constant 0 : index
    %c0_7 = arith.constant 0 : index
    %19 = vector.load %arg2[%c0_6, %c0_7] : memref<1x32xf32, #tpu.memory_space<vmem>>, vector<1x32xf32>
    %20 = vector.shape_cast %19 : vector<1x32xf32> to vector<1x1x32xf32>
    %21 = vector.broadcast %20 : vector<1x1x32xf32> to vector<1x8x32xf32>
    %22 = arith.mulf %18, %21 : vector<1x8x32xf32>
    %c0_8 = arith.constant 0 : index
    %c0_9 = arith.constant 0 : index
    %23 = vector.load %arg3[%c0_8, %c0_9] : memref<1x32xf32, #tpu.memory_space<vmem>>, vector<1x32xf32>
    %24 = vector.shape_cast %23 : vector<1x32xf32> to vector<1x1x32xf32>
    %25 = vector.broadcast %24 : vector<1x1x32xf32> to vector<1x8x32xf32>
    %26 = arith.addf %22, %25 : vector<1x8x32xf32>
    %27 = vector.shape_cast %26 : vector<1x8x32xf32> to vector<8x32xf32>
    %28 = arith.truncf %27 : vector<8x32xf32> to vector<8x32xbf16>
    %cst_10 = arith.constant 0.000000e+00 : f32
    %29 = vector.broadcast %cst_10 : f32 to vector<8x32xf32>
    %c0_11 = arith.constant 0 : index
    %c0_12 = arith.constant 0 : index
    %c0_13 = arith.constant 0 : index
    %c0_14 = arith.constant 0 : index
    %30 = vector.load %arg4[%c0_11, %c0_12, %c0_13, %c0_14] : memref<3x2x32x32xbf16, #tpu.memory_space<vmem>>, vector<1x1x32x32xbf16>
    %31 = vector.shape_cast %30 : vector<1x1x32x32xbf16> to vector<32x32xbf16>
    %cst_15 = arith.constant dense<0.000000e+00> : vector<8x32xf32>
    %32 = tpu.matmul %28, %31, %cst_15 {dimension_numbers = #tpu.dot_dimension_numbers<[1], [0], [0], [1], [0, 0, 1, 1], [], []>} : vector<8x32xbf16>, vector<32x32xbf16>, vector<8x32xf32> -> vector<8x32xf32>
    %c0_16 = arith.constant 0 : index
    %c0_17 = arith.constant 0 : index
    %c0_18 = arith.constant 0 : index
    %c0_19 = arith.constant 0 : index
    %33 = vector.load %arg5[%c0_16, %c0_17, %c0_18, %c0_19] : memref<3x2x1x32xf32, #tpu.memory_space<vmem>>, vector<1x1x1x32xf32>
    %34 = vector.shape_cast %33 : vector<1x1x1x32xf32> to vector<1x32xf32>
    %35 = vector.broadcast %34 : vector<1x32xf32> to vector<8x32xf32>
    %36 = arith.addf %32, %35 : vector<8x32xf32>
    %c1 = arith.constant 1 : index
    %c0_20 = arith.constant 0 : index
    %c0_21 = arith.constant 0 : index
    %c0_22 = arith.constant 0 : index
    %37 = vector.load %arg4[%c1, %c0_20, %c0_21, %c0_22] : memref<3x2x32x32xbf16, #tpu.memory_space<vmem>>, vector<1x1x32x32xbf16>
    %38 = vector.shape_cast %37 : vector<1x1x32x32xbf16> to vector<32x32xbf16>
    %cst_23 = arith.constant dense<0.000000e+00> : vector<8x32xf32>
    %39 = tpu.matmul %28, %38, %cst_23 {dimension_numbers = #tpu.dot_dimension_numbers<[1], [0], [0], [1], [0, 0, 1, 1], [], []>} : vector<8x32xbf16>, vector<32x32xbf16>, vector<8x32xf32> -> vector<8x32xf32>
    %c1_24 = arith.constant 1 : index
    %c0_25 = arith.constant 0 : index
    %c0_26 = arith.constant 0 : index
    %c0_27 = arith.constant 0 : index
    %40 = vector.load %arg5[%c1_24, %c0_25, %c0_26, %c0_27] : memref<3x2x1x32xf32, #tpu.memory_space<vmem>>, vector<1x1x1x32xf32>
    %41 = vector.shape_cast %40 : vector<1x1x1x32xf32> to vector<1x32xf32>
    %42 = vector.broadcast %41 : vector<1x32xf32> to vector<8x32xf32>
    %43 = arith.addf %39, %42 : vector<8x32xf32>
    %c2 = arith.constant 2 : index
    %c0_28 = arith.constant 0 : index
    %c0_29 = arith.constant 0 : index
    %c0_30 = arith.constant 0 : index
    %44 = vector.load %arg4[%c2, %c0_28, %c0_29, %c0_30] : memref<3x2x32x32xbf16, #tpu.memory_space<vmem>>, vector<1x1x32x32xbf16>
    %45 = vector.shape_cast %44 : vector<1x1x32x32xbf16> to vector<32x32xbf16>
    %cst_31 = arith.constant dense<0.000000e+00> : vector<8x32xf32>
    %46 = tpu.matmul %28, %45, %cst_31 {dimension_numbers = #tpu.dot_dimension_numbers<[1], [0], [0], [1], [0, 0, 1, 1], [], []>} : vector<8x32xbf16>, vector<32x32xbf16>, vector<8x32xf32> -> vector<8x32xf32>
    %c2_32 = arith.constant 2 : index
    %c0_33 = arith.constant 0 : index
    %c0_34 = arith.constant 0 : index
    %c0_35 = arith.constant 0 : index
    %47 = vector.load %arg5[%c2_32, %c0_33, %c0_34, %c0_35] : memref<3x2x1x32xf32, #tpu.memory_space<vmem>>, vector<1x1x1x32xf32>
    %48 = vector.shape_cast %47 : vector<1x1x1x32xf32> to vector<1x32xf32>
    %49 = vector.broadcast %48 : vector<1x32xf32> to vector<8x32xf32>
    %50 = arith.addf %46, %49 : vector<8x32xf32>
    %51 = vector.shape_cast %36 : vector<8x32xf32> to vector<1x8x32xf32>
    %52 = arith.truncf %51 : vector<1x8x32xf32> to vector<1x8x32xbf16>
    %53 = vector.shape_cast %43 : vector<8x32xf32> to vector<1x8x32xf32>
    %54 = arith.truncf %53 : vector<1x8x32xf32> to vector<1x8x32xbf16>
    %55 = vector.shape_cast %50 : vector<8x32xf32> to vector<1x8x32xf32>
    %56 = arith.truncf %55 : vector<1x8x32xf32> to vector<1x8x32xbf16>
    "tpu.trace_start"() <{level = 10 : i32, message = "bqd,bkd->bqk"}> : () -> ()
    %cst_36 = arith.constant dense<0.000000e+00> : vector<1x8x8xf32>
    %57 = tpu.matmul %52, %54, %cst_36 {dimension_numbers = #tpu.dot_dimension_numbers<[2], [2], [1], [1], [0, 0, 0, 1, 1, 1], [0], [0]>} : vector<1x8x32xbf16>, vector<1x8x32xbf16>, vector<1x8x8xf32> -> vector<1x8x8xf32>
    "tpu.trace_stop"() : () -> ()
    %cst_37 = arith.constant 0.176776692 : f32
    %58 = vector.broadcast %cst_37 : f32 to vector<1x8x8xf32>
    %59 = arith.mulf %57, %58 : vector<1x8x8xf32>
    %cst_38 = arith.constant dense<0xFF800000> : vector<1x8xf32>
    %60 = vector.multi_reduction <maximumf>, %59, %cst_38 [2] : vector<1x8x8xf32> to vector<1x8xf32>
    %61 = vector.shape_cast %60 : vector<1x8xf32> to vector<1x8x1xf32>
    %62 = vector.broadcast %61 : vector<1x8x1xf32> to vector<1x8x8xf32>
    %63 = arith.subf %59, %62 : vector<1x8x8xf32>
    %64 = math.exp %63 : vector<1x8x8xf32>
    %cst_39 = arith.constant dense<0.000000e+00> : vector<1x8xf32>
    %65 = vector.multi_reduction <add>, %64, %cst_39 [2] : vector<1x8x8xf32> to vector<1x8xf32>
    %66 = vector.shape_cast %65 : vector<1x8xf32> to vector<1x8x1xf32>
    %67 = tpu.reciprocal %66 : vector<1x8x1xf32> -> vector<1x8x1xf32>
    %68 = vector.broadcast %67 : vector<1x8x1xf32> to vector<1x8x8xf32>
    %69 = arith.mulf %64, %68 : vector<1x8x8xf32>
    %70 = arith.truncf %69 : vector<1x8x8xf32> to vector<1x8x8xbf16>
    %c0_40 = arith.constant 0 : index
    %c0_41 = arith.constant 0 : index
    %c0_42 = arith.constant 0 : index
    %c0_43 = arith.constant 0 : index
    %71 = vector.load %arg9[%c0_40, %c0_41, %c0_42, %c0_43] : memref<2x1x8x8xbf16, #tpu.memory_space<vmem>>, vector<1x1x8x8xbf16>
    %72 = vector.shape_cast %71 : vector<1x1x8x8xbf16> to vector<1x8x8xbf16>
    %73 = vector.shape_cast %70 : vector<1x8x8xbf16> to vector<1x1x8x8xbf16>
    tpu.vector_store %arg9[%c0_40, %c0_41, %c0_42, %c0_43], %73 {strides = array<i32>} : memref<2x1x8x8xbf16, #tpu.memory_space<vmem>>, vector<1x1x8x8xbf16>,
    %74 = arith.truncf %69 : vector<1x8x8xf32> to vector<1x8x8xbf16>
    "tpu.trace_start"() <{level = 10 : i32, message = "bqk,bkd->bqd"}> : () -> ()
    %cst_44 = arith.constant dense<0.000000e+00> : vector<1x8x32xf32>
    %75 = tpu.matmul %74, %56, %cst_44 {dimension_numbers = #tpu.dot_dimension_numbers<[2], [1], [1], [2], [0, 0, 0, 1, 1, 2], [0], [0]>} : vector<1x8x8xbf16>, vector<1x8x32xbf16>, vector<1x8x32xf32> -> vector<1x8x32xf32>
    "tpu.trace_stop"() : () -> ()
    %76 = vector.shape_cast %75 : vector<1x8x32xf32> to vector<8x32xf32>
    %77 = arith.truncf %76 : vector<8x32xf32> to vector<8x32xbf16>
    %c0_45 = arith.constant 0 : index
    %c0_46 = arith.constant 0 : index
    %c0_47 = arith.constant 0 : index
    %78 = vector.load %arg6[%c0_45, %c0_46, %c0_47] : memref<2x32x32xbf16, #tpu.memory_space<vmem>>, vector<1x32x32xbf16>
    %79 = vector.shape_cast %78 : vector<1x32x32xbf16> to vector<32x32xbf16>
    %cst_48 = arith.constant dense<0.000000e+00> : vector<8x32xf32>
    %80 = tpu.matmul %77, %79, %cst_48 {dimension_numbers = #tpu.dot_dimension_numbers<[1], [0], [0], [1], [0, 0, 1, 1], [], []>} : vector<8x32xbf16>, vector<32x32xbf16>, vector<8x32xf32> -> vector<8x32xf32>
    %81 = arith.addf %29, %80 : vector<8x32xf32>
    %c0_49 = arith.constant 0 : index
    %c1_50 = arith.constant 1 : index
    %c0_51 = arith.constant 0 : index
    %c0_52 = arith.constant 0 : index
    %82 = vector.load %arg4[%c0_49, %c1_50, %c0_51, %c0_52] : memref<3x2x32x32xbf16, #tpu.memory_space<vmem>>, vector<1x1x32x32xbf16>
    %83 = vector.shape_cast %82 : vector<1x1x32x32xbf16> to vector<32x32xbf16>
    %cst_53 = arith.constant dense<0.000000e+00> : vector<8x32xf32>
    %84 = tpu.matmul %28, %83, %cst_53 {dimension_numbers = #tpu.dot_dimension_numbers<[1], [0], [0], [1], [0, 0, 1, 1], [], []>} : vector<8x32xbf16>, vector<32x32xbf16>, vector<8x32xf32> -> vector<8x32xf32>
    %c0_54 = arith.constant 0 : index
    %c1_55 = arith.constant 1 : index
    %c0_56 = arith.constant 0 : index
    %c0_57 = arith.constant 0 : index
    %85 = vector.load %arg5[%c0_54, %c1_55, %c0_56, %c0_57] : memref<3x2x1x32xf32, #tpu.memory_space<vmem>>, vector<1x1x1x32xf32>
    %86 = vector.shape_cast %85 : vector<1x1x1x32xf32> to vector<1x32xf32>
    %87 = vector.broadcast %86 : vector<1x32xf32> to vector<8x32xf32>
    %88 = arith.addf %84, %87 : vector<8x32xf32>
    %c1_58 = arith.constant 1 : index
    %c1_59 = arith.constant 1 : index
    %c0_60 = arith.constant 0 : index
    %c0_61 = arith.constant 0 : index
    %89 = vector.load %arg4[%c1_58, %c1_59, %c0_60, %c0_61] : memref<3x2x32x32xbf16, #tpu.memory_space<vmem>>, vector<1x1x32x32xbf16>
    %90 = vector.shape_cast %89 : vector<1x1x32x32xbf16> to vector<32x32xbf16>
    %cst_62 = arith.constant dense<0.000000e+00> : vector<8x32xf32>
    %91 = tpu.matmul %28, %90, %cst_62 {dimension_numbers = #tpu.dot_dimension_numbers<[1], [0], [0], [1], [0, 0, 1, 1], [], []>} : vector<8x32xbf16>, vector<32x32xbf16>, vector<8x32xf32> -> vector<8x32xf32>
    %c1_63 = arith.constant 1 : index
    %c1_64 = arith.constant 1 : index
    %c0_65 = arith.constant 0 : index
    %c0_66 = arith.constant 0 : index
    %92 = vector.load %arg5[%c1_63, %c1_64, %c0_65, %c0_66] : memref<3x2x1x32xf32, #tpu.memory_space<vmem>>, vector<1x1x1x32xf32>
    %93 = vector.shape_cast %92 : vector<1x1x1x32xf32> to vector<1x32xf32>
    %94 = vector.broadcast %93 : vector<1x32xf32> to vector<8x32xf32>
    %95 = arith.addf %91, %94 : vector<8x32xf32>
    %c2_67 = arith.constant 2 : index
    %c1_68 = arith.constant 1 : index
    %c0_69 = arith.constant 0 : index
    %c0_70 = arith.constant 0 : index
    %96 = vector.load %arg4[%c2_67, %c1_68, %c0_69, %c0_70] : memref<3x2x32x32xbf16, #tpu.memory_space<vmem>>, vector<1x1x32x32xbf16>
    %97 = vector.shape_cast %96 : vector<1x1x32x32xbf16> to vector<32x32xbf16>
    %cst_71 = arith.constant dense<0.000000e+00> : vector<8x32xf32>
    %98 = tpu.matmul %28, %97, %cst_71 {dimension_numbers = #tpu.dot_dimension_numbers<[1], [0], [0], [1], [0, 0, 1, 1], [], []>} : vector<8x32xbf16>, vector<32x32xbf16>, vector<8x32xf32> -> vector<8x32xf32>
    %c2_72 = arith.constant 2 : index
    %c1_73 = arith.constant 1 : index
    %c0_74 = arith.constant 0 : index
    %c0_75 = arith.constant 0 : index
    %99 = vector.load %arg5[%c2_72, %c1_73, %c0_74, %c0_75] : memref<3x2x1x32xf32, #tpu.memory_space<vmem>>, vector<1x1x1x32xf32>
    %100 = vector.shape_cast %99 : vector<1x1x1x32xf32> to vector<1x32xf32>
    %101 = vector.broadcast %100 : vector<1x32xf32> to vector<8x32xf32>
    %102 = arith.addf %98, %101 : vector<8x32xf32>
    %103 = vector.shape_cast %88 : vector<8x32xf32> to vector<1x8x32xf32>
    %104 = arith.truncf %103 : vector<1x8x32xf32> to vector<1x8x32xbf16>
    %105 = vector.shape_cast %95 : vector<8x32xf32> to vector<1x8x32xf32>
    %106 = arith.truncf %105 : vector<1x8x32xf32> to vector<1x8x32xbf16>
    %107 = vector.shape_cast %102 : vector<8x32xf32> to vector<1x8x32xf32>
    %108 = arith.truncf %107 : vector<1x8x32xf32> to vector<1x8x32xbf16>
    "tpu.trace_start"() <{level = 10 : i32, message = "bqd,bkd->bqk"}> : () -> ()
    %cst_76 = arith.constant dense<0.000000e+00> : vector<1x8x8xf32>
    %109 = tpu.matmul %104, %106, %cst_76 {dimension_numbers = #tpu.dot_dimension_numbers<[2], [2], [1], [1], [0, 0, 0, 1, 1, 1], [0], [0]>} : vector<1x8x32xbf16>, vector<1x8x32xbf16>, vector<1x8x8xf32> -> vector<1x8x8xf32>
    "tpu.trace_stop"() : () -> ()
    %cst_77 = arith.constant 0.176776692 : f32
    %110 = vector.broadcast %cst_77 : f32 to vector<1x8x8xf32>
    %111 = arith.mulf %109, %110 : vector<1x8x8xf32>
    %cst_78 = arith.constant dense<0xFF800000> : vector<1x8xf32>
    %112 = vector.multi_reduction <maximumf>, %111, %cst_78 [2] : vector<1x8x8xf32> to vector<1x8xf32>
    %113 = vector.shape_cast %112 : vector<1x8xf32> to vector<1x8x1xf32>
    %114 = vector.broadcast %113 : vector<1x8x1xf32> to vector<1x8x8xf32>
    %115 = arith.subf %111, %114 : vector<1x8x8xf32>
    %116 = math.exp %115 : vector<1x8x8xf32>
    %cst_79 = arith.constant dense<0.000000e+00> : vector<1x8xf32>
    %117 = vector.multi_reduction <add>, %116, %cst_79 [2] : vector<1x8x8xf32> to vector<1x8xf32>
    %118 = vector.shape_cast %117 : vector<1x8xf32> to vector<1x8x1xf32>
    %119 = tpu.reciprocal %118 : vector<1x8x1xf32> -> vector<1x8x1xf32>
    %120 = vector.broadcast %119 : vector<1x8x1xf32> to vector<1x8x8xf32>
    %121 = arith.mulf %116, %120 : vector<1x8x8xf32>
    %122 = arith.truncf %121 : vector<1x8x8xf32> to vector<1x8x8xbf16>
    %c1_80 = arith.constant 1 : index
    %c0_81 = arith.constant 0 : index
    %c0_82 = arith.constant 0 : index
    %c0_83 = arith.constant 0 : index
    %123 = vector.load %arg9[%c1_80, %c0_81, %c0_82, %c0_83] : memref<2x1x8x8xbf16, #tpu.memory_space<vmem>>, vector<1x1x8x8xbf16>
    %124 = vector.shape_cast %123 : vector<1x1x8x8xbf16> to vector<1x8x8xbf16>
    %125 = vector.shape_cast %122 : vector<1x8x8xbf16> to vector<1x1x8x8xbf16>
    tpu.vector_store %arg9[%c1_80, %c0_81, %c0_82, %c0_83], %125 {strides = array<i32>} : memref<2x1x8x8xbf16, #tpu.memory_space<vmem>>, vector<1x1x8x8xbf16>,
    %126 = arith.truncf %121 : vector<1x8x8xf32> to vector<1x8x8xbf16>
    "tpu.trace_start"() <{level = 10 : i32, message = "bqk,bkd->bqd"}> : () -> ()
    %cst_84 = arith.constant dense<0.000000e+00> : vector<1x8x32xf32>
    %127 = tpu.matmul %126, %108, %cst_84 {dimension_numbers = #tpu.dot_dimension_numbers<[2], [1], [1], [2], [0, 0, 0, 1, 1, 2], [0], [0]>} : vector<1x8x8xbf16>, vector<1x8x32xbf16>, vector<1x8x32xf32> -> vector<1x8x32xf32>
    "tpu.trace_stop"() : () -> ()
    %128 = vector.shape_cast %127 : vector<1x8x32xf32> to vector<8x32xf32>
    %129 = arith.truncf %128 : vector<8x32xf32> to vector<8x32xbf16>
    %c1_85 = arith.constant 1 : index
    %c0_86 = arith.constant 0 : index
    %c0_87 = arith.constant 0 : index
    %130 = vector.load %arg6[%c1_85, %c0_86, %c0_87] : memref<2x32x32xbf16, #tpu.memory_space<vmem>>, vector<1x32x32xbf16>
    %131 = vector.shape_cast %130 : vector<1x32x32xbf16> to vector<32x32xbf16>
    %cst_88 = arith.constant dense<0.000000e+00> : vector<8x32xf32>
    %132 = tpu.matmul %129, %131, %cst_88 {dimension_numbers = #tpu.dot_dimension_numbers<[1], [0], [0], [1], [0, 0, 1, 1], [], []>} : vector<8x32xbf16>, vector<32x32xbf16>, vector<8x32xf32> -> vector<8x32xf32>
    %133 = arith.addf %81, %132 : vector<8x32xf32>
    %c0_89 = arith.constant 0 : index
    %c0_90 = arith.constant 0 : index
    %134 = vector.load %arg7[%c0_89, %c0_90] : memref<1x32xf32, #tpu.memory_space<vmem>>, vector<1x32xf32>
    %135 = vector.broadcast %134 : vector<1x32xf32> to vector<8x32xf32>
    %136 = arith.addf %133, %135 : vector<8x32xf32>
    %137 = vector.shape_cast %136 : vector<8x32xf32> to vector<1x8x32xf32>
    %138 = arith.addf %137, %0 : vector<1x8x32xf32>
    %c0_91 = arith.constant 0 : index
    %c0_92 = arith.constant 0 : index
    %c0_93 = arith.constant 0 : index
    %139 = vector.load %arg8[%c0_91, %c0_92, %c0_93] : memref<1x8x32xf32, #tpu.memory_space<vmem>>, vector<1x8x32xf32>
    tpu.vector_store %arg8[%c0_91, %c0_92, %c0_93], %138 {strides = array<i32>} : memref<1x8x32xf32, #tpu.memory_space<vmem>>, vector<1x8x32xf32>,
    return
  }
  func.func @transform_0(%arg0: i32) -> (i32, i32, i32) {
    %c0_i32 = arith.constant 0 : i32
    %c0_i32_0 = arith.constant 0 : i32
    %c0_i32_1 = arith.constant 0 : i32
    return %arg0, %c0_i32, %c0_i32_0 : i32, i32, i32
  }
  func.func @transform_1(%arg0: i32) -> (i32, i32) {
    %c0_i32 = arith.constant 0 : i32
    %c0_i32_0 = arith.constant 0 : i32
    %c0_i32_1 = arith.constant 0 : i32
    return %c0_i32, %c0_i32_0 : i32, i32
  }
  func.func @transform_2(%arg0: i32) -> (i32, i32) {
    %c0_i32 = arith.constant 0 : i32
    %c0_i32_0 = arith.constant 0 : i32
    %c0_i32_1 = arith.constant 0 : i32
    return %c0_i32, %c0_i32_0 : i32, i32
  }
  func.func @transform_3(%arg0: i32) -> (i32, i32, i32, i32) {
    %c0_i32 = arith.constant 0 : i32
    %c0_i32_0 = arith.constant 0 : i32
    %c0_i32_1 = arith.constant 0 : i32
    %c0_i32_2 = arith.constant 0 : i32
    %c0_i32_3 = arith.constant 0 : i32
    return %c0_i32, %c0_i32_0, %c0_i32_1, %c0_i32_2 : i32, i32, i32, i32
  }
  func.func @transform_4(%arg0: i32) -> (i32, i32, i32, i32) {
    %c0_i32 = arith.constant 0 : i32
    %c0_i32_0 = arith.constant 0 : i32
    %c0_i32_1 = arith.constant 0 : i32
    %c0_i32_2 = arith.constant 0 : i32
    %c0_i32_3 = arith.constant 0 : i32
    return %c0_i32, %c0_i32_0, %c0_i32_1, %c0_i32_2 : i32, i32, i32, i32
  }
  func.func @transform_5(%arg0: i32) -> (i32, i32, i32) {
    %c0_i32 = arith.constant 0 : i32
    %c0_i32_0 = arith.constant 0 : i32
    %c0_i32_1 = arith.constant 0 : i32
    %c0_i32_2 = arith.constant 0 : i32
    return %c0_i32, %c0_i32_0, %c0_i32_1 : i32, i32, i32
  }
  func.func @transform_6(%arg0: i32) -> (i32, i32) {
    %c0_i32 = arith.constant 0 : i32
    %c0_i32_0 = arith.constant 0 : i32
    %c0_i32_1 = arith.constant 0 : i32
    return %c0_i32, %c0_i32_0 : i32, i32
  }
  func.func @transform_7(%arg0: i32) -> (i32, i32, i32) {
    %c0_i32 = arith.constant 0 : i32
    %c0_i32_0 = arith.constant 0 : i32
    %c0_i32_1 = arith.constant 0 : i32
    return %arg0, %c0_i32, %c0_i32_0 : i32, i32, i32
  }
  func.func @transform_8(%arg0: i32) -> (i32, i32, i32, i32) {
    %c0_i32 = arith.constant 0 : i32
    %c0_i32_0 = arith.constant 0 : i32
    %c0_i32_1 = arith.constant 0 : i32
    %c0_i32_2 = arith.constant 0 : i32
    return %c0_i32, %arg0, %c0_i32_0, %c0_i32_1 : i32, i32, i32, i32
  }
}

module attributes {stable_mosaic.version = 11 : i64} {
  func.func @kernel(%arg0: i32, %arg1: memref<1x8x32xf32, #tpu.memory_space<vmem>>, %arg2: memref<1x32xf32, #tpu.memory_space<vmem>>, %arg3: memref<1x32xf32, #tpu.memory_space<vmem>>, %arg4: memref<3x2x32x32xbf16, #tpu.memory_space<vmem>>, %arg5: memref<3x2x1x32xf32, #tpu.memory_space<vmem>>, %arg6: memref<2x32x32xbf16, #tpu.memory_space<vmem>>, %arg7: memref<1x32xf32, #tpu.memory_space<vmem>>, %arg8: memref<1x8x32xf32, #tpu.memory_space<vmem>>, %arg9: memref<2x1x8x8xbf16, #tpu.memory_space<vmem>>) attributes {dimension_semantics = [#tpu.dimension_semantics<parallel>], iteration_bounds = array<i64: 2>, scalar_prefetch = 0 : i64, scratch_operands = 0 : i64, tpu.core_type = #tpu.core_type<tc>, window_params = [{transform_indices = @transform_0, window_bounds = array<i64: 1, 8, 32>}, {pipeline_mode = #tpu.pipeline_mode<synchronous>, transform_indices = @transform_1, window_bounds = array<i64: 1, 32>}, {pipeline_mode = #tpu.pipeline_mode<synchronous>, transform_indices = @transform_2, window_bounds = array<i64: 1, 32>}, {pipeline_mode = #tpu.pipeline_mode<synchronous>, transform_indices = @transform_3, window_bounds = array<i64: 3, 2, 32, 32>}, {pipeline_mode = #tpu.pipeline_mode<synchronous>, transform_indices = @transform_4, window_bounds = array<i64: 3, 2, 1, 32>}, {pipeline_mode = #tpu.pipeline_mode<synchronous>, transform_indices = @transform_5, window_bounds = array<i64: 2, 32, 32>}, {pipeline_mode = #tpu.pipeline_mode<synchronous>, transform_indices = @transform_6, window_bounds = array<i64: 1, 32>}, {transform_indices = @transform_7, window_bounds = array<i64: 1, 8, 32>}, {transform_indices = @transform_8, window_bounds = array<i64: 2, 1, 8, 8>}]} {
    %c0 = arith.constant 0 : index
    %c0_0 = arith.constant 0 : index
    %c0_1 = arith.constant 0 : index
    %0 = vector.load %arg1[%c0, %c0_0, %c0_1] : memref<1x8x32xf32, #tpu.memory_space<vmem>>, vector<1x8x32xf32>
    %cst = arith.constant dense<0.000000e+00> : vector<1x8xf32>
    %1 = vector.multi_reduction <add>, %0, %cst [2] : vector<1x8x32xf32> to vector<1x8xf32>
    %2 = vector.shape_cast %1 : vector<1x8xf32> to vector<1x8x1xf32>
    %cst_2 = arith.constant 3.200000e+01 : f32
    %3 = vector.broadcast %cst_2 : f32 to vector<1x8x1xf32>
    %4 = arith.divf %2, %3 : vector<1x8x1xf32>
    %5 = vector.broadcast %4 : vector<1x8x1xf32> to vector<1x8x32xf32>
    %6 = arith.subf %0, %5 : vector<1x8x32xf32>
    %7 = arith.mulf %6, %6 : vector<1x8x32xf32>
    %cst_3 = arith.constant dense<0.000000e+00> : vector<1x8xf32>
    %8 = vector.multi_reduction <add>, %7, %cst_3 [2] : vector<1x8x32xf32> to vector<1x8xf32>
    %9 = vector.shape_cast %8 : vector<1x8xf32> to vector<1x8x1xf32>
    %cst_4 = arith.constant 3.200000e+01 : f32
    %10 = vector.broadcast %cst_4 : f32 to vector<1x8x1xf32>
    %11 = arith.divf %9, %10 : vector<1x8x1xf32>
    %12 = vector.broadcast %4 : vector<1x8x1xf32> to vector<1x8x32xf32>
    %13 = arith.subf %0, %12 : vector<1x8x32xf32>
    %cst_5 = arith.constant 9.99999974E-6 : f32
    %14 = vector.broadcast %cst_5 : f32 to vector<1x8x1xf32>
    %15 = arith.addf %11, %14 : vector<1x8x1xf32>
    %16 = math.rsqrt %15 : vector<1x8x1xf32>
    %17 = vector.broadcast %16 : vector<1x8x1xf32> to vector<1x8x32xf32>
    %18 = arith.mulf %13, %17 : vector<1x8x32xf32>
    %c0_6 = arith.constant 0 : index
    %c0_7 = arith.constant 0 : index
    %19 = vector.load %arg2[%c0_6, %c0_7] : memref<1x32xf32, #tpu.memory_space<vmem>>, vector<1x32xf32>
    %20 = vector.shape_cast %19 : vector<1x32xf32> to vector<1x1x32xf32>
    %21 = vector.broadcast %20 : vector<1x1x32xf32> to vector<1x8x32xf32>
    %22 = arith.mulf %18, %21 : vector<1x8x32xf32>
    %c0_8 = arith.constant 0 : index
    %c0_9 = arith.constant 0 : index
    %23 = vector.load %arg3[%c0_8, %c0_9] : memref<1x32xf32, #tpu.memory_space<vmem>>, vector<1x32xf32>
    %24 = vector.shape_cast %23 : vector<1x32xf32> to vector<1x1x32xf32>
    %25 = vector.broadcast %24 : vector<1x1x32xf32> to vector<1x8x32xf32>
    %26 = arith.addf %22, %25 : vector<1x8x32xf32>
    %27 = vector.shape_cast %26 : vector<1x8x32xf32> to vector<8x32xf32>
    %28 = arith.truncf %27 : vector<8x32xf32> to vector<8x32xbf16>
    %cst_10 = arith.constant 0.000000e+00 : f32
    %29 = vector.broadcast %cst_10 : f32 to vector<8x32xf32>
    %c0_11 = arith.constant 0 : index
    %c0_12 = arith.constant 0 : index
    %c0_13 = arith.constant 0 : index
    %c0_14 = arith.constant 0 : index
    %30 = vector.load %arg4[%c0_11, %c0_12, %c0_13, %c0_14] : memref<3x2x32x32xbf16, #tpu.memory_space<vmem>>, vector<1x1x32x32xbf16>
    %31 = vector.shape_cast %30 : vector<1x1x32x32xbf16> to vector<32x32xbf16>
    %cst_15 = arith.constant dense<0.000000e+00> : vector<8x32xf32>
    %32 = tpu.matmul %28, %31, %cst_15 {dimension_numbers = #tpu.dot_dimension_numbers<[1], [0], [0], [1], [0, 0, 1, 1], [], []>} : vector<8x32xbf16>, vector<32x32xbf16>, vector<8x32xf32> -> vector<8x32xf32>
    %c0_16 = arith.constant 0 : index
    %c0_17 = arith.constant 0 : index
    %c0_18 = arith.constant 0 : index
    %c0_19 = arith.constant 0 : index
    %33 = vector.load %arg5[%c0_16, %c0_17, %c0_18, %c0_19] : memref<3x2x1x32xf32, #tpu.memory_space<vmem>>, vector<1x1x1x32xf32>
    %34 = vector.shape_cast %33 : vector<1x1x1x32xf32> to vector<1x32xf32>
    %35 = vector.broadcast %34 : vector<1x32xf32> to vector<8x32xf32>
    %36 = arith.addf %32, %35 : vector<8x32xf32>
    %c1 = arith.constant 1 : index
    %c0_20 = arith.constant 0 : index
    %c0_21 = arith.constant 0 : index
    %c0_22 = arith.constant 0 : index
    %37 = vector.load %arg4[%c1, %c0_20, %c0_21, %c0_22] : memref<3x2x32x32xbf16, #tpu.memory_space<vmem>>, vector<1x1x32x32xbf16>
    %38 = vector.shape_cast %37 : vector<1x1x32x32xbf16> to vector<32x32xbf16>
    %cst_23 = arith.constant dense<0.000000e+00> : vector<8x32xf32>
    %39 = tpu.matmul %28, %38, %cst_23 {dimension_numbers = #tpu.dot_dimension_numbers<[1], [0], [0], [1], [0, 0, 1, 1], [], []>} : vector<8x32xbf16>, vector<32x32xbf16>, vector<8x32xf32> -> vector<8x32xf32>
    %c1_24 = arith.constant 1 : index
    %c0_25 = arith.constant 0 : index
    %c0_26 = arith.constant 0 : index
    %c0_27 = arith.constant 0 : index
    %40 = vector.load %arg5[%c1_24, %c0_25, %c0_26, %c0_27] : memref<3x2x1x32xf32, #tpu.memory_space<vmem>>, vector<1x1x1x32xf32>
    %41 = vector.shape_cast %40 : vector<1x1x1x32xf32> to vector<1x32xf32>
    %42 = vector.broadcast %41 : vector<1x32xf32> to vector<8x32xf32>
    %43 = arith.addf %39, %42 : vector<8x32xf32>
    %c2 = arith.constant 2 : index
    %c0_28 = arith.constant 0 : index
    %c0_29 = arith.constant 0 : index
    %c0_30 = arith.constant 0 : index
    %44 = vector.load %arg4[%c2, %c0_28, %c0_29, %c0_30] : memref<3x2x32x32xbf16, #tpu.memory_space<vmem>>, vector<1x1x32x32xbf16>
    %45 = vector.shape_cast %44 : vector<1x1x32x32xbf16> to vector<32x32xbf16>
    %cst_31 = arith.constant dense<0.000000e+00> : vector<8x32xf32>
    %46 = tpu.matmul %28, %45, %cst_31 {dimension_numbers = #tpu.dot_dimension_numbers<[1], [0], [0], [1], [0, 0, 1, 1], [], []>} : vector<8x32xbf16>, vector<32x32xbf16>, vector<8x32xf32> -> vector<8x32xf32>
    %c2_32 = arith.constant 2 : index
    %c0_33 = arith.constant 0 : index
    %c0_34 = arith.constant 0 : index
    %c0_35 = arith.constant 0 : index
    %47 = vector.load %arg5[%c2_32, %c0_33, %c0_34, %c0_35] : memref<3x2x1x32xf32, #tpu.memory_space<vmem>>, vector<1x1x1x32xf32>
    %48 = vector.shape_cast %47 : vector<1x1x1x32xf32> to vector<1x32xf32>
    %49 = vector.broadcast %48 : vector<1x32xf32> to vector<8x32xf32>
    %50 = arith.addf %46, %49 : vector<8x32xf32>
    %51 = vector.shape_cast %36 : vector<8x32xf32> to vector<1x8x32xf32>
    %52 = arith.truncf %51 : vector<1x8x32xf32> to vector<1x8x32xbf16>
    %53 = vector.shape_cast %43 : vector<8x32xf32> to vector<1x8x32xf32>
    %54 = arith.truncf %53 : vector<1x8x32xf32> to vector<1x8x32xbf16>
    %55 = vector.shape_cast %50 : vector<8x32xf32> to vector<1x8x32xf32>
    %56 = arith.truncf %55 : vector<1x8x32xf32> to vector<1x8x32xbf16>
    "tpu.trace_start"() <{level = 10 : i32, message = "bqd,bkd->bqk"}> : () -> ()
    %cst_36 = arith.constant dense<0.000000e+00> : vector<1x8x8xf32>
    %57 = tpu.matmul %52, %54, %cst_36 {dimension_numbers = #tpu.dot_dimension_numbers<[2], [2], [1], [1], [0, 0, 0, 1, 1, 1], [0], [0]>} : vector<1x8x32xbf16>, vector<1x8x32xbf16>, vector<1x8x8xf32> -> vector<1x8x8xf32>
    "tpu.trace_stop"() : () -> ()
    %cst_37 = arith.constant 0.176776692 : f32
    %58 = vector.broadcast %cst_37 : f32 to vector<1x8x8xf32>
    %59 = arith.mulf %57, %58 : vector<1x8x8xf32>
    %cst_38 = arith.constant dense<0xFF800000> : vector<1x8xf32>
    %60 = vector.multi_reduction <maximumf>, %59, %cst_38 [2] : vector<1x8x8xf32> to vector<1x8xf32>
    %61 = vector.shape_cast %60 : vector<1x8xf32> to vector<1x8x1xf32>
    %62 = vector.broadcast %61 : vector<1x8x1xf32> to vector<1x8x8xf32>
    %63 = arith.subf %59, %62 : vector<1x8x8xf32>
    %64 = math.exp %63 : vector<1x8x8xf32>
    %cst_39 = arith.constant dense<0.000000e+00> : vector<1x8xf32>
    %65 = vector.multi_reduction <add>, %64, %cst_39 [2] : vector<1x8x8xf32> to vector<1x8xf32>
    %66 = vector.shape_cast %65 : vector<1x8xf32> to vector<1x8x1xf32>
    %67 = tpu.reciprocal %66 : vector<1x8x1xf32> -> vector<1x8x1xf32>
    %68 = vector.broadcast %67 : vector<1x8x1xf32> to vector<1x8x8xf32>
    %69 = arith.mulf %64, %68 : vector<1x8x8xf32>
    %70 = arith.truncf %69 : vector<1x8x8xf32> to vector<1x8x8xbf16>
    %c0_40 = arith.constant 0 : index
    %c0_41 = arith.constant 0 : index
    %c0_42 = arith.constant 0 : index
    %c0_43 = arith.constant 0 : index
    %71 = vector.load %arg9[%c0_40, %c0_41, %c0_42, %c0_43] : memref<2x1x8x8xbf16, #tpu.memory_space<vmem>>, vector<1x1x8x8xbf16>
    %72 = vector.shape_cast %71 : vector<1x1x8x8xbf16> to vector<1x8x8xbf16>
    %73 = vector.shape_cast %70 : vector<1x8x8xbf16> to vector<1x1x8x8xbf16>
    tpu.vector_store %arg9[%c0_40, %c0_41, %c0_42, %c0_43], %73 {strides = array<i32>} : memref<2x1x8x8xbf16, #tpu.memory_space<vmem>>, vector<1x1x8x8xbf16>,
    %74 = arith.truncf %69 : vector<1x8x8xf32> to vector<1x8x8xbf16>
    "tpu.trace_start"() <{level = 10 : i32, message = "bqk,bkd->bqd"}> : () -> ()
    %cst_44 = arith.constant dense<0.000000e+00> : vector<1x8x32xf32>
    %75 = tpu.matmul %74, %56, %cst_44 {dimension_numbers = #tpu.dot_dimension_numbers<[2], [1], [1], [2], [0, 0, 0, 1, 1, 2], [0], [0]>} : vector<1x8x8xbf16>, vector<1x8x32xbf16>, vector<1x8x32xf32> -> vector<1x8x32xf32>
    "tpu.trace_stop"() : () -> ()
    %76 = vector.shape_cast %75 : vector<1x8x32xf32> to vector<8x32xf32>
    %77 = arith.truncf %76 : vector<8x32xf32> to vector<8x32xbf16>
    %c0_45 = arith.constant 0 : index
    %c0_46 = arith.constant 0 : index
    %c0_47 = arith.constant 0 : index
    %78 = vector.load %arg6[%c0_45, %c0_46, %c0_47] : memref<2x32x32xbf16, #tpu.memory_space<vmem>>, vector<1x32x32xbf16>
    %79 = vector.shape_cast %78 : vector<1x32x32xbf16> to vector<32x32xbf16>
    %cst_48 = arith.constant dense<0.000000e+00> : vector<8x32xf32>
    %80 = tpu.matmul %77, %79, %cst_48 {dimension_numbers = #tpu.dot_dimension_numbers<[1], [0], [0], [1], [0, 0, 1, 1], [], []>} : vector<8x32xbf16>, vector<32x32xbf16>, vector<8x32xf32> -> vector<8x32xf32>
    %81 = arith.addf %29, %80 : vector<8x32xf32>
    %c0_49 = arith.constant 0 : index
    %c1_50 = arith.constant 1 : index
    %c0_51 = arith.constant 0 : index
    %c0_52 = arith.constant 0 : index
    %82 = vector.load %arg4[%c0_49, %c1_50, %c0_51, %c0_52] : memref<3x2x32x32xbf16, #tpu.memory_space<vmem>>, vector<1x1x32x32xbf16>
    %83 = vector.shape_cast %82 : vector<1x1x32x32xbf16> to vector<32x32xbf16>
    %cst_53 = arith.constant dense<0.000000e+00> : vector<8x32xf32>
    %84 = tpu.matmul %28, %83, %cst_53 {dimension_numbers = #tpu.dot_dimension_numbers<[1], [0], [0], [1], [0, 0, 1, 1], [], []>} : vector<8x32xbf16>, vector<32x32xbf16>, vector<8x32xf32> -> vector<8x32xf32>
    %c0_54 = arith.constant 0 : index
    %c1_55 = arith.constant 1 : index
    %c0_56 = arith.constant 0 : index
    %c0_57 = arith.constant 0 : index
    %85 = vector.load %arg5[%c0_54, %c1_55, %c0_56, %c0_57] : memref<3x2x1x32xf32, #tpu.memory_space<vmem>>, vector<1x1x1x32xf32>
    %86 = vector.shape_cast %85 : vector<1x1x1x32xf32> to vector<1x32xf32>
    %87 = vector.broadcast %86 : vector<1x32xf32> to vector<8x32xf32>
    %88 = arith.addf %84, %87 : vector<8x32xf32>
    %c1_58 = arith.constant 1 : index
    %c1_59 = arith.constant 1 : index
    %c0_60 = arith.constant 0 : index
    %c0_61 = arith.constant 0 : index
    %89 = vector.load %arg4[%c1_58, %c1_59, %c0_60, %c0_61] : memref<3x2x32x32xbf16, #tpu.memory_space<vmem>>, vector<1x1x32x32xbf16>
    %90 = vector.shape_cast %89 : vector<1x1x32x32xbf16> to vector<32x32xbf16>
    %cst_62 = arith.constant dense<0.000000e+00> : vector<8x32xf32>
    %91 = tpu.matmul %28, %90, %cst_62 {dimension_numbers = #tpu.dot_dimension_numbers<[1], [0], [0], [1], [0, 0, 1, 1], [], []>} : vector<8x32xbf16>, vector<32x32xbf16>, vector<8x32xf32> -> vector<8x32xf32>
    %c1_63 = arith.constant 1 : index
    %c1_64 = arith.constant 1 : index
    %c0_65 = arith.constant 0 : index
    %c0_66 = arith.constant 0 : index
    %92 = vector.load %arg5[%c1_63, %c1_64, %c0_65, %c0_66] : memref<3x2x1x32xf32, #tpu.memory_space<vmem>>, vector<1x1x1x32xf32>
    %93 = vector.shape_cast %92 : vector<1x1x1x32xf32> to vector<1x32xf32>
    %94 = vector.broadcast %93 : vector<1x32xf32> to vector<8x32xf32>
    %95 = arith.addf %91, %94 : vector<8x32xf32>
    %c2_67 = arith.constant 2 : index
    %c1_68 = arith.constant 1 : index
    %c0_69 = arith.constant 0 : index
    %c0_70 = arith.constant 0 : index
    %96 = vector.load %arg4[%c2_67, %c1_68, %c0_69, %c0_70] : memref<3x2x32x32xbf16, #tpu.memory_space<vmem>>, vector<1x1x32x32xbf16>
    %97 = vector.shape_cast %96 : vector<1x1x32x32xbf16> to vector<32x32xbf16>
    %cst_71 = arith.constant dense<0.000000e+00> : vector<8x32xf32>
    %98 = tpu.matmul %28, %97, %cst_71 {dimension_numbers = #tpu.dot_dimension_numbers<[1], [0], [0], [1], [0, 0, 1, 1], [], []>} : vector<8x32xbf16>, vector<32x32xbf16>, vector<8x32xf32> -> vector<8x32xf32>
    %c2_72 = arith.constant 2 : index
    %c1_73 = arith.constant 1 : index
    %c0_74 = arith.constant 0 : index
    %c0_75 = arith.constant 0 : index
    %99 = vector.load %arg5[%c2_72, %c1_73, %c0_74, %c0_75] : memref<3x2x1x32xf32, #tpu.memory_space<vmem>>, vector<1x1x1x32xf32>
    %100 = vector.shape_cast %99 : vector<1x1x1x32xf32> to vector<1x32xf32>
    %101 = vector.broadcast %100 : vector<1x32xf32> to vector<8x32xf32>
    %102 = arith.addf %98, %101 : vector<8x32xf32>
    %103 = vector.shape_cast %88 : vector<8x32xf32> to vector<1x8x32xf32>
    %104 = arith.truncf %103 : vector<1x8x32xf32> to vector<1x8x32xbf16>
    %105 = vector.shape_cast %95 : vector<8x32xf32> to vector<1x8x32xf32>
    %106 = arith.truncf %105 : vector<1x8x32xf32> to vector<1x8x32xbf16>
    %107 = vector.shape_cast %102 : vector<8x32xf32> to vector<1x8x32xf32>
    %108 = arith.truncf %107 : vector<1x8x32xf32> to vector<1x8x32xbf16>
    "tpu.trace_start"() <{level = 10 : i32, message = "bqd,bkd->bqk"}> : () -> ()
    %cst_76 = arith.constant dense<0.000000e+00> : vector<1x8x8xf32>
    %109 = tpu.matmul %104, %106, %cst_76 {dimension_numbers = #tpu.dot_dimension_numbers<[2], [2], [1], [1], [0, 0, 0, 1, 1, 1], [0], [0]>} : vector<1x8x32xbf16>, vector<1x8x32xbf16>, vector<1x8x8xf32> -> vector<1x8x8xf32>
    "tpu.trace_stop"() : () -> ()
    %cst_77 = arith.constant 0.176776692 : f32
    %110 = vector.broadcast %cst_77 : f32 to vector<1x8x8xf32>
    %111 = arith.mulf %109, %110 : vector<1x8x8xf32>
    %cst_78 = arith.constant dense<0xFF800000> : vector<1x8xf32>
    %112 = vector.multi_reduction <maximumf>, %111, %cst_78 [2] : vector<1x8x8xf32> to vector<1x8xf32>
    %113 = vector.shape_cast %112 : vector<1x8xf32> to vector<1x8x1xf32>
    %114 = vector.broadcast %113 : vector<1x8x1xf32> to vector<1x8x8xf32>
    %115 = arith.subf %111, %114 : vector<1x8x8xf32>
    %116 = math.exp %115 : vector<1x8x8xf32>
    %cst_79 = arith.constant dense<0.000000e+00> : vector<1x8xf32>
    %117 = vector.multi_reduction <add>, %116, %cst_79 [2] : vector<1x8x8xf32> to vector<1x8xf32>
    %118 = vector.shape_cast %117 : vector<1x8xf32> to vector<1x8x1xf32>
    %119 = tpu.reciprocal %118 : vector<1x8x1xf32> -> vector<1x8x1xf32>
    %120 = vector.broadcast %119 : vector<1x8x1xf32> to vector<1x8x8xf32>
    %121 = arith.mulf %116, %120 : vector<1x8x8xf32>
    %122 = arith.truncf %121 : vector<1x8x8xf32> to vector<1x8x8xbf16>
    %c1_80 = arith.constant 1 : index
    %c0_81 = arith.constant 0 : index
    %c0_82 = arith.constant 0 : index
    %c0_83 = arith.constant 0 : index
    %123 = vector.load %arg9[%c1_80, %c0_81, %c0_82, %c0_83] : memref<2x1x8x8xbf16, #tpu.memory_space<vmem>>, vector<1x1x8x8xbf16>
    %124 = vector.shape_cast %123 : vector<1x1x8x8xbf16> to vector<1x8x8xbf16>
    %125 = vector.shape_cast %122 : vector<1x8x8xbf16> to vector<1x1x8x8xbf16>
    tpu.vector_store %arg9[%c1_80, %c0_81, %c0_82, %c0_83], %125 {strides = array<i32>} : memref<2x1x8x8xbf16, #tpu.memory_space<vmem>>, vector<1x1x8x8xbf16>,
    %126 = arith.truncf %121 : vector<1x8x8xf32> to vector<1x8x8xbf16>
    "tpu.trace_start"() <{level = 10 : i32, message = "bqk,bkd->bqd"}> : () -> ()
    %cst_84 = arith.constant dense<0.000000e+00> : vector<1x8x32xf32>
    %127 = tpu.matmul %126, %108, %cst_84 {dimension_numbers = #tpu.dot_dimension_numbers<[2], [1], [1], [2], [0, 0, 0, 1, 1, 2], [0], [0]>} : vector<1x8x8xbf16>, vector<1x8x32xbf16>, vector<1x8x32xf32> -> vector<1x8x32xf32>
    "tpu.trace_stop"() : () -> ()
    %128 = vector.shape_cast %127 : vector<1x8x32xf32> to vector<8x32xf32>
    %129 = arith.truncf %128 : vector<8x32xf32> to vector<8x32xbf16>
    %c1_85 = arith.constant 1 : index
    %c0_86 = arith.constant 0 : index
    %c0_87 = arith.constant 0 : index
    %130 = vector.load %arg6[%c1_85, %c0_86, %c0_87] : memref<2x32x32xbf16, #tpu.memory_space<vmem>>, vector<1x32x32xbf16>
    %131 = vector.shape_cast %130 : vector<1x32x32xbf16> to vector<32x32xbf16>
    %cst_88 = arith.constant dense<0.000000e+00> : vector<8x32xf32>
    %132 = tpu.matmul %129, %131, %cst_88 {dimension_numbers = #tpu.dot_dimension_numbers<[1], [0], [0], [1], [0, 0, 1, 1], [], []>} : vector<8x32xbf16>, vector<32x32xbf16>, vector<8x32xf32> -> vector<8x32xf32>
    %133 = arith.addf %81, %132 : vector<8x32xf32>
    %c0_89 = arith.constant 0 : index
    %c0_90 = arith.constant 0 : index
    %134 = vector.load %arg7[%c0_89, %c0_90] : memref<1x32xf32, #tpu.memory_space<vmem>>, vector<1x32xf32>
    %135 = vector.broadcast %134 : vector<1x32xf32> to vector<8x32xf32>
    %136 = arith.addf %133, %135 : vector<8x32xf32>
    %137 = vector.shape_cast %136 : vector<8x32xf32> to vector<1x8x32xf32>
    %138 = arith.addf %137, %0 : vector<1x8x32xf32>
    %c0_91 = arith.constant 0 : index
    %c0_92 = arith.constant 0 : index
    %c0_93 = arith.constant 0 : index
    %139 = vector.load %arg8[%c0_91, %c0_92, %c0_93] : memref<1x8x32xf32, #tpu.memory_space<vmem>>, vector<1x8x32xf32>
    tpu.vector_store %arg8[%c0_91, %c0_92, %c0_93], %138 {strides = array<i32>} : memref<1x8x32xf32, #tpu.memory_space<vmem>>, vector<1x8x32xf32>,
    return
  }
  func.func @transform_0(%arg0: i32) -> (i32, i32, i32) {
    %c0_i32 = arith.constant 0 : i32
    %c0_i32_0 = arith.constant 0 : i32
    %c0_i32_1 = arith.constant 0 : i32
    return %arg0, %c0_i32, %c0_i32_0 : i32, i32, i32
  }
  func.func @transform_1(%arg0: i32) -> (i32, i32) {
    %c0_i32 = arith.constant 0 : i32
    %c0_i32_0 = arith.constant 0 : i32
    %c0_i32_1 = arith.constant 0 : i32
    return %c0_i32, %c0_i32_0 : i32, i32
  }
  func.func @transform_2(%arg0: i32) -> (i32, i32) {
    %c0_i32 = arith.constant 0 : i32
    %c0_i32_0 = arith.constant 0 : i32
    %c0_i32_1 = arith.constant 0 : i32
    return %c0_i32, %c0_i32_0 : i32, i32
  }
  func.func @transform_3(%arg0: i32) -> (i32, i32, i32, i32) {
    %c0_i32 = arith.constant 0 : i32
    %c0_i32_0 = arith.constant 0 : i32
    %c0_i32_1 = arith.constant 0 : i32
    %c0_i32_2 = arith.constant 0 : i32
    %c0_i32_3 = arith.constant 0 : i32
    return %c0_i32, %c0_i32_0, %c0_i32_1, %c0_i32_2 : i32, i32, i32, i32
  }
  func.func @transform_4(%arg0: i32) -> (i32, i32, i32, i32) {
    %c0_i32 = arith.constant 0 : i32
    %c0_i32_0 = arith.constant 0 : i32
    %c0_i32_1 = arith.constant 0 : i32
    %c0_i32_2 = arith.constant 0 : i32
    %c0_i32_3 = arith.constant 0 : i32
    return %c0_i32, %c0_i32_0, %c0_i32_1, %c0_i32_2 : i32, i32, i32, i32
  }
  func.func @transform_5(%arg0: i32) -> (i32, i32, i32) {
    %c0_i32 = arith.constant 0 : i32
    %c0_i32_0 = arith.constant 0 : i32
    %c0_i32_1 = arith.constant 0 : i32
    %c0_i32_2 = arith.constant 0 : i32
    return %c0_i32, %c0_i32_0, %c0_i32_1 : i32, i32, i32
  }
  func.func @transform_6(%arg0: i32) -> (i32, i32) {
    %c0_i32 = arith.constant 0 : i32
    %c0_i32_0 = arith.constant 0 : i32
    %c0_i32_1 = arith.constant 0 : i32
    return %c0_i32, %c0_i32_0 : i32, i32
  }
  func.func @transform_7(%arg0: i32) -> (i32, i32, i32) {
    %c0_i32 = arith.constant 0 : i32
    %c0_i32_0 = arith.constant 0 : i32
    %c0_i32_1 = arith.constant 0 : i32
    return %arg0, %c0_i32, %c0_i32_0 : i32, i32, i32
  }
  func.func @transform_8(%arg0: i32) -> (i32, i32, i32, i32) {
    %c0_i32 = arith.constant 0 : i32
    %c0_i32_0 = arith.constant 0 : i32
    %c0_i32_1 = arith.constant 0 : i32
    %c0_i32_2 = arith.constant 0 : i32
    return %c0_i32, %arg0, %c0_i32_0, %c0_i32_1 : i32, i32, i32, i32
  }
}

</mosaic_0001>

<bundles_post_ra>
// kernel: tpu_custom_call.1
= control target key start
LH: loop header
LB: loop body
LE: loop exit
PB: predicated region body
PF: predicated region fallthrough
CT: control target
= control target key end

     0   :  { %s1827_s0 = inlined_call_operand.hbm [shape: f32[2,8,32], index: 0, kind: input, shape index: {}]   ;;  %s1828_s1 = inlined_call_operand.hbm [shape: f32[1,32], index: 1, kind: input, shape index: {}]   ;;  %s1829_s2 = inlined_call_operand.vmem [shape: f32[1,32], index: 2, kind: input, shape index: {}]   ;;  %s1830_s3 = inlined_call_operand.hbm [shape: bf16[3,2,32,32], index: 3, kind: input, shape index: {}]   ;;  %s1831_s4 = inlined_call_operand.hbm [shape: f32[3,2,1,32], index: 4, kind: input, shape index: {}]   ;;  %s1832_s5 = inlined_call_operand.hbm [shape: bf16[2,32,32], index: 5, kind: input, shape index: {}]   ;;  %s1833_s6 = inlined_call_operand.vmem [shape: f32[1,32], index: 6, kind: input, shape index: {}]   ;;  %s1834_s7 = inlined_call_operand.hbm [shape: f32[2,8,32], index: 7, kind: output, shape index: {0}]   ;;  %s1835_s8 = inlined_call_operand.hbm [shape: bf16[2,2,8,8], index: 8, kind: output, shape index: {1}]  }
   0x1   :  { %1836 = sst [smem:[#allocation19_spill]] %s1827_s0 }
   0x2   :  { %1837 = sst [smem:[#allocation20_spill]] %s1828_s1 }
   0x3   :  { %1838 = sst [smem:[#allocation21_spill]] %s1830_s3 }
   0x4   :  { %1839 = sst [smem:[#allocation22_spill]] %s1831_s4 }
   0x5   :  { %14 = vsyncpa [#allocation3], 0 }
   0x6   :  { %16 = vsyncpa [#allocation3 + $0x1], 0 }
   0x7   :  { %17 = vsyncpa [#allocation6], 0 }
   0x8   :  { %18 = vsyncpa [#allocation9], 0 }
   0x9   :  { %19 = vsyncpa [#allocation4], 0 }
   0xa   :  { %21 = vsyncpa [#allocation4 + $0x1], 0 }
   0xb   :  { %22 = vsyncpa [#allocation13], 0 }
   0xc   :  { %24 = vsyncpa [#allocation13 + $0x1], 0  ;;  %s1596_s27 = smov 0   ;;  %s1598_s28 = smov 0  }
   0xd   :  { %s1600_s29 = smov 0   ;;  %s1602_s30 = smov 0  }
   0xe LB: > { %s1840_s1 = sld [smem:[#allocation20_spill]]  ;;  %s1620_s12 = sadd.s32 4294967295, %s1537_s30   ;;  %s1537_s30 = sphi %s1602_s30, %s1855_s30   ;;  %s1533_s29 = sphi %s1600_s29, %s1854_s29   ;;  %s1529_s28 = sphi %s1598_s28, %s1853_s28   ;;  %s1525_s27 = sphi %s1596_s27, %s1852_s27  }
   0xf   : > { %p1045_p0 = scmp.ge.s32.totalorder %s1537_s30, 1  ;;  %p51_p1 = scmp.eq.s32.totalorder %s1620_s12, 0 }
  0x10   : > { %p239_p2 = scmp.lt.s32.totalorder %s1537_s30, 3  ;;  %s1539_s14 = smov [#allocation5]  }
  0x11   : > { %s253_s15 = sshll.u32 %s1539_s14, 4  ;;  %s1842_s4 = sld [smem:[#allocation22_spill]]  ;;  %s254_s15 = int_to_ptr.vmem [resolvable:$true] %s253_s15 }
  0x12   : > { %p1625_p3 = pnand %p1045_p0, %p239_p2  ;;  %s1540_s20 = smov [#allocation8]  }
  0x13   : > { %s281_s21 = sshll.u32 %s1540_s20, 4  ;;  %s1541_s22 = smov 16   ;;  %s282_s21 = int_to_ptr.vmem [resolvable:$true] %s281_s21 }
  0x14   : > { %s251_s11 = sshll.u32 %s1840_s1, 4  ;;  %p1182_p5 = pneg %p1625_p3  ;;  %s252_s11 = int_to_ptr.hbm [resolvable:$true] %s251_s11 }
  0x15   : > { %s1542_s23 = smov 1   ;;  %s1844_s3 = sld [smem:[#allocation21_spill]] }
  0x16   : > { %p1637_p6 = pnand %p1182_p5, %p51_p1  ;;  %s1543_s9 = smov [#allocation7]  }
  0x17   : > { %s279_s18 = sshll.u32 %s1842_s4, 4  ;;  %s267_s10 = sshll.u32 %s1543_s9, 4  ;;  %s280_s18 = int_to_ptr.hbm [resolvable:$true] %s279_s18  ;;  %s268_s10 = int_to_ptr.vmem [resolvable:$true] %s267_s10 }
  0x18   : > { %1185 = dma.hbm_to_vmem [thread:$0]  (!%p1637_p6), %s252_s11, 16, %s254_s15, [#allocation6]  }
  0x19   : > { %1191 = dma.hbm_to_vmem [thread:$0]  (!%p1637_p6), %s280_s18, 96, %s282_s21, [#allocation9], %s1541_s22, %s1541_s22, %s1542_s23  }
  0x1a   : > { %s293_s15 = sshll.u32 %s1832_s5, 4  ;;  %s1544_s16 = smov 64   ;;  %s294_s15 = int_to_ptr.hbm [resolvable:$true] %s293_s15 }
  0x1b   : > { %s265_s26 = sshll.u32 %s1844_s3, 4  ;;  %s1545_s17 = smov 4   ;;  %s266_s26 = int_to_ptr.hbm [resolvable:$true] %s265_s26 }
  0x1c   : > { %1188 = dma.hbm_to_vmem [thread:$0]  (!%p1637_p6), %s266_s26, 1536, %s268_s10, [#allocation6], %s1544_s16, %s1544_s16, %s1545_s17  }
  0x1d   : > { %s1546_s18 = smov [#allocation10]   ;;  %s1044_s21 = sadd.s32 4294967294, %s1537_s30  }
  0x1e   : > { %s295_s20 = sshll.u32 %s1546_s18, 4  ;;  %s1657_s22 = sadd.s32 1, %s1537_s30   ;;  %s296_s20 = int_to_ptr.vmem [resolvable:$true] %s295_s20 }
  0x1f   : > { %1194 = dma.hbm_to_vmem [thread:$0]  (!%p1637_p6), %s294_s15, 512, %s296_s20, [#allocation9], %s1544_s16, %s1544_s16, %s1545_s17  }
  0x20   : > { %s34_s23 = ssub.s32 %s1537_s30, %s1657_s22  ;;  %s37_s24 = sadd.s32 1, %s1533_s29 }
  0x21   : > { %p35_p7 = scmp.eq.s32.totalorder %s34_s23, 0  ;;  %p44_p8 = scmp.ne.s32.totalorder %s1533_s29, %s1529_s28 }
  0x22   : > { %p45_p9 = scmp.eq.s32.totalorder %s1537_s30, 0  ;;  %p50_p10 = scmp.ne.s32.totalorder %s1529_s28, %s1525_s27 }
  0x23   : > { %s1668_s25 = scalar_select %p35_p7, %s1533_s29, %s37_s24  }
  0x24   : > { %p1670_p11 = por %p45_p9, %p44_p8  ;;  %p1676_p12 = por %p51_p1, %p50_p10 }
  0x25   : > { %p200_p13 = scmp.eq.s32.totalorder %s1620_s12, 1  ;;  %p206_p0 = scmp.eq.s32.totalorder %s1044_s21, 1 }
  0x26   : > { %p1210_p2 = scmp.lt.s32.totalorder %s1537_s30, 2  ;;  %s312_s9 = sand.u32 1, %s1533_s29  }
  0x27   : > { %p1683_p5 = por %p200_p13, %p44_p8  ;;  %p1687_p6 = por %p206_p0, %p50_p10 }
  0x28   : > { %s1051_s14 = sshll.u32 %s312_s9, 3  ;;  %s1052_s15 = sshll.u32 %s1537_s30, 3 }
  0x29   : > { %s1849_s0 = sld [smem:[#allocation19_spill]]  ;;  %s316_s20 = scalar_lea.vmem [#allocation2], %s1051_s14 }
  0x2a   : > { %s324_s23 = sshll.u32 %s316_s20, 4  ;;  %p1697_p7 = pnand %p1210_p2, %p1670_p11  ;;  %s325_s23 = int_to_ptr.vmem [resolvable:$true] %s324_s23 }
  0x2b   : > { %s313_s1 = scalar_lea.sflag [#allocation3], %s312_s9 }
  0x2c   : > { %p1405_p9 = pneg %p1697_p7 }
  0x2f   : > { %s320_s18 = scalar_lea.hbm %s1849_s0, %s1052_s15  ;;  %s1408_s16 = scalar_lea.hbm %s1849_s0, 16 }
  0x30   : > { %s322_s24 = sshll.u32 %s320_s18, 4  ;;  %s323_s24 = int_to_ptr.hbm [resolvable:$true] %s322_s24 }
  0x31   : > { %s1401_s3 = sshra.s32 %s323_s24, 4  ;;  %s1402_s3 = int_to_ptr.hbm [resolvable:$true] %s1401_s3 }
  0x32   : > { %s1403_s4 = scalar_lea.hbm %s1402_s3, 8  ;;  %p1409_p11 = scmp.lt.s32.totalorder %s1402_s3, %s1849_s0 }
  0x33   : > { %p1404_p8 = scmp.ne.s32.totalorder %s1402_s3, %s1403_s4  ;;  %p1410_p0 = scmp.lt.s32.totalorder %s1408_s16, %s1403_s4 }
  0x35   : > { %p1406_p10 = pnand %p1405_p9, %p1404_p8  ;;  %p1411_p2 = por %p1410_p0, %p1409_p11 }
  0x37   : > { %p1407_p13 = pneg %p1406_p10 }
  0x39   : > { %p1412_p4 = pnand %p1411_p2, %p1407_p13 }
  0x3b   : > { %1415 = shalt.err (!%p1412_p4)
}
  0x3c   : > { %1198 = dma.hbm_to_vmem [thread:$0]  (!%p1697_p7), %s323_s24, 128, %s325_s23, %s313_s1  }
  0x3d   : > { %333 = sbr.rel (%p1625_p3) target bundleno = 1560 (0x618), region = 48  ;;  %s1714_s9 = sand.u32 (!%p1625_p3), 1, %s1529_s28  }
  0x3e   : > { %s1717_s18 = sshll.u32 (!%p1625_p3), %s1714_s9, 3  ;;  %s336_s3 = scalar_lea.sflag (!%p1625_p3), [#allocation3], %s1714_s9 }
  0x3f   : > { %s339_s4 = scalar_lea.vmem (!%p1625_p3), [#allocation2], %s1717_s18 }
  0x42   : > { %1504 = dma.done.wait (%p1676_p12), %s336_s3, 128  }
  0x43   : > { %1506 = vsyncadd (%p1676_p12), %s336_s3, 4294967168 }
  0x44   : > { %1508 = dma.done.wait (%p51_p1), [#allocation6], 1552  }
  0x45   : > { %1510 = vsyncadd (%p51_p1), [#allocation6], 4294965744 }
  0x46   : > { %1512 = dma.done.wait (%p51_p1), [#allocation9], 608  }
  0x47   : > { %1514 = vsyncadd (%p51_p1), [#allocation9], 4294966688  ;;  %vm400_vm0 = vcmask 261120   ;;  %v1733_v0 = vld [vmem:[%s339_s4] sm:$0xff]  ;;  %v1547_v2 = vmov 32.0   ;;  %v1144_v17 = vld [vmem:[#allocation7] sm:$0xff] }
  0x48   : > { %v401_v1 = vsel %vm400_vm0, %v1733_v0, 0.0  ;;  %1269 = vrcp.f32 %v1547_v2  ;;  %v1145_v14 = vld [vmem:[#allocation7 + $0x8] sm:$0xff]  ;;  %v1146_v18 = vld [vmem:[#allocation7 + $0x20] sm:$0xff]  ;;  %v1153_v21 = vld [vmem:[#allocation7 + $0x18] sm:$0xff]  ;;  %vm601_vm5 = vcmask 1043456   ;;  %vm570_vm6 = vcmask 64512  }
  0x49   : > { %402 = vadd.xlane.f32.xlu0 %v401_v1  ;;  %v1147_v15 = vld [vmem:[#allocation7 + $0x28] sm:$0xff]  ;;  %470 = vmatpush.bf16.msra.mxu0 %v1145_v14  ;;  %v1148_v19 = vld [vmem:[#allocation7 + $0x40] sm:$0xff]  ;;  %v1155_v22 = vld [vmem:[#allocation7 + $0x38] sm:$0xff]  ;;  %vm596_vm11 = vcmask 60416   ;;  %s1756_s19 = scalar_lea.vmem [#allocation12], %s1717_s18  ;;  %s1141_s20 = sshll.u32 %s1620_s12, 2 }
  0x4a   : > { %v1149_v16 = vld [vmem:[#allocation7 + $0x48] sm:$0xff]  ;;  %505 = vmatpush.bf16.msra.mxu1 %v1147_v15  ;;  %v1152_v24 = vld [vmem:[#allocation7 + $0x10] sm:$0xff]  ;;  %v1260_v33 = vld [vmem:[#allocation5] ss:$0 sm:$0xff]  ;;  %s896_s21 = scalar_lea.hbm %s1835_s8, %s1141_s20  ;;  %s897_s14 = sshll.u32 %s1756_s19, 4  ;;  %s898_s14 = int_to_ptr.vmem [resolvable:$true] %s897_s14 }
  0x4b   : > { %540 = vmatpush.bf16.msra.mxu2 %v1149_v16  ;;  %v1154_v25 = vld [vmem:[#allocation7 + $0x30] sm:$0xff]  ;;  %v1261_v35 = vld [vmem:[%s1829_s2] ss:$0 sm:$0xff]  ;;  %v1263_v40 = vld [vmem:[#allocation8 + $0x2] ss:$0 sm:$0xff]  ;;  %s899_s15 = sshll.u32 %s896_s21, 4  ;;  %s900_s15 = int_to_ptr.hbm [resolvable:$true] %s899_s15 }
  0x4c   : > { %v1262_v44 = vld [vmem:[#allocation8] ss:$0 sm:$0xff]  ;;  %v1157_v46 = vld [vmem:[#allocation7 + $0x58] sm:$0xff]  ;;  %v1264_v47 = vld [vmem:[#allocation8 + $0x4] ss:$0 sm:$0xff]  ;;  %s872_s16 = scalar_lea.sflag [#allocation13], %s1714_s9 }
  0x4d   : > { %471 = vmatpush.bf16.msra.mxu0 %v1144_v17  ;;  %v1156_v51 = vld [vmem:[#allocation7 + $0x50] sm:$0xff]  ;;  %v1266_v60 = vld [vmem:[#allocation8 + $0x3] ss:$0 sm:$0xff]  ;;  %s1445_s17 = sshra.s32 %s900_s15, 4  ;;  %s1451_s1 = scalar_lea.hbm %s1835_s8, 16  ;;  %s1446_s17 = int_to_ptr.hbm [resolvable:$true] %s1445_s17 }
  0x4e   : > { %v1270_v3 = vpop.eup %1269  ;;  %506 = vmatpush.bf16.msra.mxu1 %v1146_v18  ;;  %s1447_s26 = scalar_lea.hbm %s1446_s17, 8  ;;  %p1452_p12 = scmp.lt.s32.totalorder %s1446_s17, %s1835_s8 }
  0x4f   : > { %v405_v4 = vmul.f32 32.0, %v1270_v3  ;;  %vm409_vm1 = vweird.f32 %v1270_v3  ;;  %541 = vmatpush.bf16.msra.mxu2 %v1148_v19  ;;  %p1448_p1 = scmp.ne.s32.totalorder %s1446_s17, %s1447_s26  ;;  %p1453_p7 = scmp.lt.s32.totalorder %s1451_s1, %s1447_s26 }
  0x51   : > { %v406_v5 = vsub.f32 1.0, %v405_v4  ;;  %p1449_p3 = pnand %p1448_p1, %p1683_p5  ;;  %p1454_p8 = por %p1453_p7, %p1452_p12 }
  0x52   : > { %651 = vmatpush.bf16.msrb.mxu1 %v1153_v21 }
  0x53   : > { %v407_v6 = vmul.f32 %v1270_v3, %v406_v5  ;;  %686 = vmatpush.bf16.msrb.mxu2 %v1155_v22  ;;  %p1450_p4 = pneg %p1449_p3 }
  0x55   : > { %v408_v7 = vadd.f32 %v1270_v3, %v407_v6  ;;  %p1455_p9 = pnand %p1454_p8, %p1450_p4 }
  0x56   : > { %652 = vmatpush.bf16.msrb.mxu1 %v1152_v24 }
  0x57   : > { %v410_v8 = vsel %vm409_vm1, %v1270_v3, %v408_v7  ;;  %687 = vmatpush.bf16.msrb.mxu2 %v1154_v25 }
  0xbc   : > { %v403_v9 = vpop.xlane.xlu0 %402 }
  0xbd   : > { %v411_v10 = vmul.f32 %v410_v8, %v403_v9 }
  0xbf   : > { %v412_v11 = vsub.f32 %v1733_v0, %v411_v10 }
  0xc1   : > { %v413_v12 = vmul.f32 %v412_v11, %v412_v11 }
  0xc3   : > { %v414_v13 = vsel %vm400_vm0, %v413_v12, 0.0 }
  0xc4   : > { %415 = vadd.xlane.f32.xlu0 %v414_v13 }
 0x137   : > { %v416_v20 = vpop.xlane.xlu0 %415 }
 0x138   : > { %v417_v23 = vmul.f32 %v416_v20, %v410_v8  ;;  %v1267_v8 = vld [vmem:[#allocation8 + $0x5] ss:$0 sm:$0xff]  ;;  %v1151_v20 = vld [vmem:[#allocation10 + $0x8] sm:$0xff] }
 0x13a   : > { %v418_v26 = vadd.f32 1e-05, %v417_v23 }
 0x13c   : > { %1271 = vrsqrt.f32 %v418_v26  ;;  %vm425_vm3 = vweird.f32 %v418_v26 }
 0x142   : > { %v1272_v27 = vpop.eup %1271 }
 0x143   : > { %v420_v28 = vmul.f32 %v1272_v27, %v418_v26  ;;  %vm426_vm2 = vweird.f32 %v1272_v27 }
 0x144   : > { %vm427_vm4 = vmor %vm425_vm3, %vm426_vm2 }
 0x145   : > { %v421_v29 = vmul.f32 %v1272_v27, %v420_v28 }
 0x147   : > { %v422_v30 = vmul.f32 0.5, %v421_v29 }
 0x149   : > { %v423_v31 = vsub.f32 1.5, %v422_v30 }
 0x14b   : > { %v424_v32 = vmul.f32 %v1272_v27, %v423_v31 }
 0x14d   : > { %v428_v34 = vsel %vm427_vm4, %v1272_v27, %v424_v32 }
 0x14e   : > { %v429_v36 = vmul.f32 %v428_v34, %v412_v11 }
 0x150   : > { %v434_v37 = vmul.f32 %v1260_v33, %v429_v36  ;;  %v1265_v33 = vld [vmem:[#allocation8 + $0x1] ss:$0 sm:$0xff]  ;;  %v1150_v36 = vld [vmem:[#allocation10] sm:$0xff] }
 0x152   : > { %v439_v38 = vadd.f32 %v1261_v35, %v434_v37 }
 0x154   : > { %v440_v39 = vpack.c.bf16 %v439_v38, %v439_v38 }
 0x156   : > { %1069 = vmatmul.msk.bf16.vlgmr.msra.gmra.mxu0 %vm400_vm0, %v440_v39  ;;  %1078 = vmatmul.msk.bf16.vlgmr.msra.gmra.mxu1 %vm400_vm0, %v440_v39 }
 0x157   : > { %1087 = vmatmul.msk.bf16.vlgmr.msra.gmra.mxu2 %vm400_vm0, %v440_v39 }
 0x166   : > { %1098 = vmatmul.msk.bf16.vlgmr.msrb.gmra.mxu1 %vm400_vm0, %v440_v39 }
 0x167   : > { %1107 = vmatmul.msk.bf16.vlgmr.msrb.gmra.mxu2 %vm400_vm0, %v440_v39 }
 0x1d3   : > { %v473_v41 = vpop.f32.mrf.mxu0  ;;  %v508_v42 = vpop.f32.mrf.mxu1 }
 0x1d4   : > { %v509_v43 = vadd.f32 %v1263_v40, %v508_v42  ;;  %v474_v49 = vadd.f32 %v1262_v44, %v473_v41 }
 0x1d6   : > { %v548_v45 = vpack.c.bf16 %v509_v43, %v509_v43  ;;  %v547_v56 = vpack.c.bf16 %v474_v49, %v474_v49 }
 0x1d8   : > { %v554_v48 = vsel %vm400_vm0, %v548_v45, 0 }
 0x1d9   : > { %563 = vmatpush.bf16.xpose.msra.mxu3 %v554_v48 }
 0x1da   : > { %v543_v50 = vpop.f32.mrf.mxu2 }
 0x1db   : > { %v544_v52 = vadd.f32 %v1264_v47, %v543_v50  ;;  %v475_v53 = vpop.f32.mrf.mxu0  ;;  %v510_v54 = vpop.f32.mrf.mxu1 }
 0x1dd   : > { %v549_v55 = vpack.c.bf16 %v544_v52, %v544_v52  ;;  %v1158_v52 = vld [vmem:[#allocation10 + $0x10] sm:$0xff] }
 0x1df   : > { %v603_v57 = vsel %vm601_vm5, %v549_v55, 0 }
 0x1e0   : > { %612 = vmatpush.bf16.msrb.mxu0 %v603_v57  ;;  %1088 = vmatmul.msk.bf16.vlgmr.msra.gmra.mxu3 %vm400_vm0, %v547_v56 }
 0x1e1   : > { %721 = vmatpush.bf16.msrb.mxu3 %v1157_v46 }
 0x1e2   : > { %v545_v58 = vpop.f32.mrf.mxu2 }
 0x1e3   : > { %v654_v59 = vpop.f32.mrf.mxu1 }
 0x1e4   : > { %v655_v34 = vadd.f32 %v1265_v33, %v654_v59 }
 0x1e5   : > { %722 = vmatpush.bf16.msrb.mxu3 %v1156_v51  ;;  %v1159_v51 = vld [vmem:[#allocation10 + $0x18] sm:$0xff] }
 0x1e6   : > { %v728_v35 = vpack.c.bf16 %v655_v34, %v655_v34  ;;  %824 = vmatpush.bf16.msra.mxu2 %v1159_v51 }
 0x1e9   : > { %852 = vmatpush.bf16.msra.mxu3 %v1151_v20 }
 0x1ea   : > { %v689_v61 = vpop.f32.mrf.mxu2  ;;  %825 = vmatpush.bf16.msra.mxu2 %v1158_v52 }
 0x1eb   : > { %v690_v62 = vadd.f32 %v1266_v60, %v689_v61  ;;  %v656_v63 = vpop.f32.mrf.mxu1 }
 0x1ed   : > { %v729_v1 = vpack.c.bf16 %v690_v62, %v690_v62  ;;  %853 = vmatpush.bf16.msra.mxu3 %v1150_v36 }
 0x1ef   : > { %v735_v2 = vsel %vm400_vm0, %v729_v1, 0 }
 0x1f0   : > { %744 = vmatpush.bf16.xpose.msra.mxu0 %v735_v2  ;;  %1116 = vmatmul.msk.bf16.vlgmr.msrb.gmra.mxu3 %vm400_vm0, %v440_v39 }
 0x1f2   : > { %v691_v3 = vpop.f32.mrf.mxu2 }
 0x263   : > { %v565_v4 = vpop.f32.mrf.mxu3 }
 0x264   : > { %v569_v5 = vmul.f32 0.17677669, %v565_v4 }
 0x266   : > { %v571_v6 = vsel %vm570_vm6, %v569_v5, -inf }
 0x267   : > { %572 = vmax.xlane.f32.xlu1 %v571_v6 }
 0x26b   : > { %v567_v7 = vpop.f32.mrf.mxu3 }
 0x273   : > { %v724_v9 = vpop.f32.mrf.mxu3 }
 0x274   : > { %v725_v10 = vadd.f32 %v1267_v8, %v724_v9 }
 0x276   : > { %v730_v11 = vpack.c.bf16 %v725_v10, %v725_v10 }
 0x278   : > { %v782_v12 = vsel %vm601_vm5, %v730_v11, 0 }
 0x279   : > { %791 = vmatpush.bf16.msra.mxu1 %v782_v12 }
 0x27b   : > { %v726_v13 = vpop.f32.mrf.mxu3 }
 0x2da   : > { %v573_v14 = vpop.xlane.xlu1 %572 }
 0x2db   : > { %v574_v15 = vsub.f32 %v569_v5, %v573_v14 }
 0x2dd   : > { %v575_v16 = vmul.f32 1.442695, %v574_v15 }
 0x2df   : > { %1273 = vpow2.f32 %v575_v16 }
 0x2e5   : > { %v1274_v17 = vpop.eup %1273 }
 0x2e6   : > { %v577_v18 = vsel %vm570_vm6, %v1274_v17, 0.0 }
 0x2e7   : > { %578 = vadd.xlane.f32.xlu1 %v577_v18 }
 0x35a   : > { %v579_v19 = vpop.xlane.xlu1 %578 }
 0x35b   : > { %1275 = vrcp.f32 %v579_v19  ;;  %v591_v24 = vand.u32 2147483648, %v579_v19  ;;  %v589_v26 = vand.u32 2147483647, %v579_v19  ;;  %vm585_vm8 = vweird.f32 %v579_v19 }
 0x35d   : > { %v592_v28 = vor.u32 1.1754944e-38, %v591_v24  ;;  %vm590_vm10 = vcmp.eq.f32.partialorder %v589_v26, 8.507059e+37 }
 0x361   : > { %v1276_v21 = vpop.eup %1275 }
 0x362   : > { %v581_v22 = vmul.f32 %v1276_v21, %v579_v19  ;;  %vm586_vm7 = vweird.f32 %v1276_v21 }
 0x363   : > { %vm587_vm9 = vmor %vm585_vm8, %vm586_vm7 }
 0x364   : > { %v582_v23 = vsub.f32 1.0, %v581_v22 }
 0x366   : > { %v583_v25 = vmul.f32 %v1276_v21, %v582_v23 }
 0x368   : > { %v584_v27 = vadd.f32 %v1276_v21, %v583_v25 }
 0x36a   : > { %v588_v29 = vsel %vm587_vm9, %v1276_v21, %v584_v27 }
 0x36b   : > { %v593_v30 = vsel %vm590_vm10, %v592_v28, %v588_v29 }
 0x36c   : > { %v594_v31 = vmul.f32 %v1274_v17, %v593_v30 }
 0x36e   : > { %v595_v32 = vpack.c.bf16 %v594_v31, %v594_v31 }
 0x370   : > { %597 = vst.msk [vmem:[%s1756_s19] sm:$0xf] %vm596_vm11, %v595_v32  ;;  %1089 = vmatmul.msk.bf16.vlgmr.msrb.gmra.mxu0 %vm570_vm6, %v595_v32 }
 0x380   : > { %1117 = vmatmul.msk.bf16.vlgmr.msra.gmra.mxu0 %vm400_vm0, %v728_v35 }
 0x3ed   : > { %v614_v37 = vpop.f32.mrf.mxu0 }
 0x3ee   : > { %v618_v38 = vpack.c.bf16 %v614_v37, %v614_v37 }
 0x3f0   : > { %1137 = vmatmul.msk.bf16.vlgmr.msra.gmra.mxu3 %vm400_vm0, %v618_v38 }
 0x3f5   : > { %v616_v39 = vpop.f32.mrf.mxu0 }
 0x3fd   : > { %v746_v40 = vpop.f32.mrf.mxu0 }
 0x3fe   : > { %v750_v41 = vmul.f32 0.17677669, %v746_v40 }
 0x400   : > { %v751_v42 = vsel %vm570_vm6, %v750_v41, -inf }
 0x401   : > { %752 = vmax.xlane.f32.xlu2 %v751_v42 }
 0x405   : > { %v748_v43 = vpop.f32.mrf.mxu0 }
 0x473   : > { %v1764_v44 = vpop.f32.mrf.mxu3 }
 0x474   : > { %v753_v45 = vpop.xlane.xlu2 %752 }
 0x475   : > { %v754_v46 = vsub.f32 %v750_v41, %v753_v45 }
 0x477   : > { %v755_v47 = vmul.f32 1.442695, %v754_v46 }
 0x479   : > { %1277 = vpow2.f32 %v755_v47 }
 0x47b   : > { %v857_v48 = vpop.f32.mrf.mxu3 }
 0x47f   : > { %v1278_v49 = vpop.eup %1277 }
 0x480   : > { %v757_v50 = vsel %vm570_vm6, %v1278_v49, 0.0 }
 0x481   : > { %758 = vadd.xlane.f32.xlu2 %v757_v50 }
 0x4f4   : > { %v759_v53 = vpop.xlane.xlu2 %758 }
 0x4f5   : > { %1279 = vrcp.f32 %v759_v53  ;;  %v771_v57 = vand.u32 2147483648, %v759_v53  ;;  %v769_v59 = vand.u32 2147483647, %v759_v53  ;;  %vm765_vm13 = vweird.f32 %v759_v53 }
 0x4f7   : > { %v772_v61 = vor.u32 1.1754944e-38, %v771_v57  ;;  %vm770_vm15 = vcmp.eq.f32.partialorder %v769_v59, 8.507059e+37 }
 0x4fb   : > { %v1280_v54 = vpop.eup %1279 }
 0x4fc   : > { %v761_v55 = vmul.f32 %v1280_v54, %v759_v53  ;;  %vm766_vm12 = vweird.f32 %v1280_v54 }
 0x4fd   : > { %vm767_vm14 = vmor %vm765_vm13, %vm766_vm12 }
 0x4fe   : > { %v762_v56 = vsub.f32 1.0, %v761_v55 }
 0x500   : > { %v763_v58 = vmul.f32 %v1280_v54, %v762_v56 }
 0x502   : > { %v764_v60 = vadd.f32 %v1280_v54, %v763_v58 }
 0x504   : > { %v768_v62 = vsel %vm767_vm14, %v1280_v54, %v764_v60 }
 0x505   : > { %v773_v63 = vsel %vm770_vm15, %v772_v61, %v768_v62 }
 0x506   : > { %v774_v1 = vmul.f32 %v1278_v49, %v773_v63 }
 0x508   : > { %v775_v2 = vpack.c.bf16 %v774_v1, %v774_v1 }
 0x50a   : > { %1118 = vst.msk [vmem:[%s1756_s19 + $0x4] sm:$0xf] %vm596_vm11, %v775_v2  ;;  %1119 = vmatmul.msk.bf16.vlgmr.msra.gmra.mxu1 %vm570_vm6, %v775_v2 }
 0x587   : > { %v793_v3 = vpop.f32.mrf.mxu1 }
 0x588   : > { %v797_v4 = vpack.c.bf16 %v793_v3, %v793_v3 }
 0x58a   : > { %1128 = vmatmul.msk.bf16.vlgmr.msra.gmra.mxu2 %vm400_vm0, %v797_v4 }
 0x58f   : > { %v795_v5 = vpop.f32.mrf.mxu1 }
 0x590   : > { %1458 = shalt.err (!%p1455_p9)
}
 0x591   : > { %s1548_s19 = smov 64   ;;  %s1549_s20 = smov 128   ;;  %v1268_v6 = vld [vmem:[%s1833_s6] ss:$0 sm:$0xff] }
 0x592   : > { %s1550_s23 = smov 4   ;;  %s1140_s24 = sshll.u32 %s1620_s12, 3 }
 0x593   : > { %1179 = dma.vmem_to_hbm [thread:$0]  (%p1683_p5), %s898_s14, 128, %s900_s15, %s872_s16, %s1548_s19, %s1549_s20, %s1550_s23  }
 0x594   : > { %s882_s26 = scalar_lea.hbm %s1834_s7, %s1140_s24  ;;  %s390_s4 = scalar_lea.vmem [#allocation11], %s1717_s18 }
 0x595   : > { %s884_s1 = sshll.u32 %s390_s4, 4  ;;  %s886_s13 = sshll.u32 %s882_s26, 4  ;;  %s885_s1 = int_to_ptr.vmem [resolvable:$true] %s884_s1  ;;  %s887_s13 = int_to_ptr.hbm [resolvable:$true] %s886_s13 }
 0x596   : > { %s867_s12 = scalar_lea.sflag [#allocation4], %s1714_s9  ;;  %s1473_s14 = sshra.s32 %s887_s13, 4  ;;  %s1474_s14 = int_to_ptr.hbm [resolvable:$true] %s1473_s14 }
 0x597   : > { %s1475_s15 = scalar_lea.hbm %s1474_s14, 8  ;;  %s1479_s19 = scalar_lea.hbm %s1834_s7, 16 }
 0x598   : > { %p1476_p10 = scmp.ne.s32.totalorder %s1474_s14, %s1475_s15  ;;  %p1480_p0 = scmp.lt.s32.totalorder %s1474_s14, %s1834_s7 }
 0x599   : > { %p1481_p2 = scmp.lt.s32.totalorder %s1479_s19, %s1475_s15 }
 0x59a   : > { %p1477_p13 = pnand %p1476_p10, %p1683_p5 }
 0x59b   : > { %p1482_p1 = por %p1481_p2, %p1480_p0 }
 0x59c   : > { %p1478_p11 = pneg %p1477_p13 }
 0x59e   : > { %p1483_p3 = pnand %p1482_p1, %p1478_p11 }
 0x60d   : > { %v827_v7 = vpop.f32.mrf.mxu2 }
 0x60e   : > { %v856_v8 = vadd.f32 %v1764_v44, %v827_v7 }
 0x610   : > { %v863_v9 = vadd.f32 %v1268_v6, %v856_v8 }
 0x612   : > { %v864_v10 = vadd.f32 %v863_v9, %v1733_v0 }
 0x614   : > { %865 = vst.msk [vmem:[%s390_s4] sm:$0xff] %vm400_vm0, %v864_v10 }
 0x615   : > { %v829_v11 = vpop.f32.mrf.mxu2 }
 0x616   : > { %1486 = shalt.err (!%p1483_p3)
}
 0x617   : > { %1178 = dma.vmem_to_hbm [thread:$0]  (%p1683_p5), %s885_s1, 128, %s887_s13, %s867_s12  }
 0x618 PF: > { %s914_s9 = sand.u32 1, %s1525_s27   ;;  %p1851_p4 = scmp.ge.s32.totalorder %s1537_s30, 2 }
 0x619   : > { %s915_s24 = scalar_lea.sflag [#allocation4], %s914_s9 }
 0x61a   : > { %p1200_p12 = pnand %p1851_p4, %p1687_p6 }
 0x61c   : > { %p1201_p7 = pneg %p1200_p12 }
 0x61e   : > { %1516 = dma.done.wait (%p1201_p7), %s915_s24, 128  }
 0x61f   : > { %1518 = vsyncadd (%p1201_p7), %s915_s24, 4294967168  ;;  %s925_s21 = scalar_lea.sflag [#allocation13], %s914_s9 }
 0x620   : > { %1520 = dma.done.wait (%p1201_p7), %s925_s21, 128  }
 0x621   : > { %1522 = vsyncadd (%p1201_p7), %s925_s21, 4294967168  ;;  %p27_p5 = scmp.ge.s32.totalorder %s1657_s22, 4   ;;  %s1852_s27 = smov %s1529_s28 }
 0x622   : > { %s1853_s28 = smov %s1533_s29  ;;  %s1854_s29 = smov %s1668_s25 }
 0x623   : > { %s1855_s30 = smov %s1657_s22  ;;  %29 = sbr.rel (!%p27_p5) target bundleno = 14 (0xe), region = 138 }
 0x628   :  { %931 = vsyncpa [#allocation3], 1 }
 0x629   :  { %933 = vsyncpa [#allocation3 + $0x1], 1 }
 0x62a   :  { %934 = vsyncpa [#allocation6], 1 }
 0x62b   :  { %935 = vsyncpa [#allocation9], 1 }
 0x62c   :  { %936 = vsyncpa [#allocation4], 1 }
 0x62d   :  { %938 = vsyncpa [#allocation4 + $0x1], 1 }
 0x62e   :  { %939 = vsyncpa [#allocation13], 1 }
 0x62f   :  { %941 = vsyncpa [#allocation13 + $0x1], 1 }

// kernel: tpu_custom_call.1
= control target key start
LH: loop header
LB: loop body
LE: loop exit
PB: predicated region body
PF: predicated region fallthrough
CT: control target
= control target key end

     0   :  { %s1827_s0 = inlined_call_operand.hbm [shape: f32[2,8,32], index: 0, kind: input, shape index: {}]   ;;  %s1828_s1 = inlined_call_operand.hbm [shape: f32[1,32], index: 1, kind: input, shape index: {}]   ;;  %s1829_s2 = inlined_call_operand.vmem [shape: f32[1,32], index: 2, kind: input, shape index: {}]   ;;  %s1830_s3 = inlined_call_operand.hbm [shape: bf16[3,2,32,32], index: 3, kind: input, shape index: {}]   ;;  %s1831_s4 = inlined_call_operand.hbm [shape: f32[3,2,1,32], index: 4, kind: input, shape index: {}]   ;;  %s1832_s5 = inlined_call_operand.hbm [shape: bf16[2,32,32], index: 5, kind: input, shape index: {}]   ;;  %s1833_s6 = inlined_call_operand.vmem [shape: f32[1,32], index: 6, kind: input, shape index: {}]   ;;  %s1834_s7 = inlined_call_operand.hbm [shape: f32[2,8,32], index: 7, kind: output, shape index: {0}]   ;;  %s1835_s8 = inlined_call_operand.hbm [shape: bf16[2,2,8,8], index: 8, kind: output, shape index: {1}]  }
   0x1   :  { %1836 = sst [smem:[#allocation19_spill]] %s1827_s0 }
   0x2   :  { %1837 = sst [smem:[#allocation20_spill]] %s1828_s1 }
   0x3   :  { %1838 = sst [smem:[#allocation21_spill]] %s1830_s3 }
   0x4   :  { %1839 = sst [smem:[#allocation22_spill]] %s1831_s4 }
   0x5   :  { %14 = vsyncpa [#allocation3], 0 }
   0x6   :  { %16 = vsyncpa [#allocation3 + $0x1], 0 }
   0x7   :  { %17 = vsyncpa [#allocation6], 0 }
   0x8   :  { %18 = vsyncpa [#allocation9], 0 }
   0x9   :  { %19 = vsyncpa [#allocation4], 0 }
   0xa   :  { %21 = vsyncpa [#allocation4 + $0x1], 0 }
   0xb   :  { %22 = vsyncpa [#allocation13], 0 }
   0xc   :  { %24 = vsyncpa [#allocation13 + $0x1], 0  ;;  %s1596_s27 = smov 0   ;;  %s1598_s28 = smov 0  }
   0xd   :  { %s1600_s29 = smov 0   ;;  %s1602_s30 = smov 0  }
   0xe LB: > { %s1840_s1 = sld [smem:[#allocation20_spill]]  ;;  %s1620_s12 = sadd.s32 4294967295, %s1537_s30   ;;  %s1537_s30 = sphi %s1602_s30, %s1855_s30   ;;  %s1533_s29 = sphi %s1600_s29, %s1854_s29   ;;  %s1529_s28 = sphi %s1598_s28, %s1853_s28   ;;  %s1525_s27 = sphi %s1596_s27, %s1852_s27  }
   0xf   : > { %p1045_p0 = scmp.ge.s32.totalorder %s1537_s30, 1  ;;  %p51_p1 = scmp.eq.s32.totalorder %s1620_s12, 0 }
  0x10   : > { %p239_p2 = scmp.lt.s32.totalorder %s1537_s30, 3  ;;  %s1539_s14 = smov [#allocation5]  }
  0x11   : > { %s253_s15 = sshll.u32 %s1539_s14, 4  ;;  %s1842_s4 = sld [smem:[#allocation22_spill]]  ;;  %s254_s15 = int_to_ptr.vmem [resolvable:$true] %s253_s15 }
  0x12   : > { %p1625_p3 = pnand %p1045_p0, %p239_p2  ;;  %s1540_s20 = smov [#allocation8]  }
  0x13   : > { %s281_s21 = sshll.u32 %s1540_s20, 4  ;;  %s1541_s22 = smov 16   ;;  %s282_s21 = int_to_ptr.vmem [resolvable:$true] %s281_s21 }
  0x14   : > { %s251_s11 = sshll.u32 %s1840_s1, 4  ;;  %p1182_p5 = pneg %p1625_p3  ;;  %s252_s11 = int_to_ptr.hbm [resolvable:$true] %s251_s11 }
  0x15   : > { %s1542_s23 = smov 1   ;;  %s1844_s3 = sld [smem:[#allocation21_spill]] }
  0x16   : > { %p1637_p6 = pnand %p1182_p5, %p51_p1  ;;  %s1543_s9 = smov [#allocation7]  }
  0x17   : > { %s279_s18 = sshll.u32 %s1842_s4, 4  ;;  %s267_s10 = sshll.u32 %s1543_s9, 4  ;;  %s280_s18 = int_to_ptr.hbm [resolvable:$true] %s279_s18  ;;  %s268_s10 = int_to_ptr.vmem [resolvable:$true] %s267_s10 }
  0x18   : > { %1185 = dma.hbm_to_vmem [thread:$0]  (!%p1637_p6), %s252_s11, 16, %s254_s15, [#allocation6]  }
  0x19   : > { %1191 = dma.hbm_to_vmem [thread:$0]  (!%p1637_p6), %s280_s18, 96, %s282_s21, [#allocation9], %s1541_s22, %s1541_s22, %s1542_s23  }
  0x1a   : > { %s293_s15 = sshll.u32 %s1832_s5, 4  ;;  %s1544_s16 = smov 64   ;;  %s294_s15 = int_to_ptr.hbm [resolvable:$true] %s293_s15 }
  0x1b   : > { %s265_s26 = sshll.u32 %s1844_s3, 4  ;;  %s1545_s17 = smov 4   ;;  %s266_s26 = int_to_ptr.hbm [resolvable:$true] %s265_s26 }
  0x1c   : > { %1188 = dma.hbm_to_vmem [thread:$0]  (!%p1637_p6), %s266_s26, 1536, %s268_s10, [#allocation6], %s1544_s16, %s1544_s16, %s1545_s17  }
  0x1d   : > { %s1546_s18 = smov [#allocation10]   ;;  %s1044_s21 = sadd.s32 4294967294, %s1537_s30  }
  0x1e   : > { %s295_s20 = sshll.u32 %s1546_s18, 4  ;;  %s1657_s22 = sadd.s32 1, %s1537_s30   ;;  %s296_s20 = int_to_ptr.vmem [resolvable:$true] %s295_s20 }
  0x1f   : > { %1194 = dma.hbm_to_vmem [thread:$0]  (!%p1637_p6), %s294_s15, 512, %s296_s20, [#allocation9], %s1544_s16, %s1544_s16, %s1545_s17  }
  0x20   : > { %s34_s23 = ssub.s32 %s1537_s30, %s1657_s22  ;;  %s37_s24 = sadd.s32 1, %s1533_s29 }
  0x21   : > { %p35_p7 = scmp.eq.s32.totalorder %s34_s23, 0  ;;  %p44_p8 = scmp.ne.s32.totalorder %s1533_s29, %s1529_s28 }
  0x22   : > { %p45_p9 = scmp.eq.s32.totalorder %s1537_s30, 0  ;;  %p50_p10 = scmp.ne.s32.totalorder %s1529_s28, %s1525_s27 }
  0x23   : > { %s1668_s25 = scalar_select %p35_p7, %s1533_s29, %s37_s24  }
  0x24   : > { %p1670_p11 = por %p45_p9, %p44_p8  ;;  %p1676_p12 = por %p51_p1, %p50_p10 }
  0x25   : > { %p200_p13 = scmp.eq.s32.totalorder %s1620_s12, 1  ;;  %p206_p0 = scmp.eq.s32.totalorder %s1044_s21, 1 }
  0x26   : > { %p1210_p2 = scmp.lt.s32.totalorder %s1537_s30, 2  ;;  %s312_s9 = sand.u32 1, %s1533_s29  }
  0x27   : > { %p1683_p5 = por %p200_p13, %p44_p8  ;;  %p1687_p6 = por %p206_p0, %p50_p10 }
  0x28   : > { %s1051_s14 = sshll.u32 %s312_s9, 3  ;;  %s1052_s15 = sshll.u32 %s1537_s30, 3 }
  0x29   : > { %s1849_s0 = sld [smem:[#allocation19_spill]]  ;;  %s316_s20 = scalar_lea.vmem [#allocation2], %s1051_s14 }
  0x2a   : > { %s324_s23 = sshll.u32 %s316_s20, 4  ;;  %p1697_p7 = pnand %p1210_p2, %p1670_p11  ;;  %s325_s23 = int_to_ptr.vmem [resolvable:$true] %s324_s23 }
  0x2b   : > { %s313_s1 = scalar_lea.sflag [#allocation3], %s312_s9 }
  0x2c   : > { %p1405_p9 = pneg %p1697_p7 }
  0x2f   : > { %s320_s18 = scalar_lea.hbm %s1849_s0, %s1052_s15  ;;  %s1408_s16 = scalar_lea.hbm %s1849_s0, 16 }
  0x30   : > { %s322_s24 = sshll.u32 %s320_s18, 4  ;;  %s323_s24 = int_to_ptr.hbm [resolvable:$true] %s322_s24 }
  0x31   : > { %s1401_s3 = sshra.s32 %s323_s24, 4  ;;  %s1402_s3 = int_to_ptr.hbm [resolvable:$true] %s1401_s3 }
  0x32   : > { %s1403_s4 = scalar_lea.hbm %s1402_s3, 8  ;;  %p1409_p11 = scmp.lt.s32.totalorder %s1402_s3, %s1849_s0 }
  0x33   : > { %p1404_p8 = scmp.ne.s32.totalorder %s1402_s3, %s1403_s4  ;;  %p1410_p0 = scmp.lt.s32.totalorder %s1408_s16, %s1403_s4 }
  0x35   : > { %p1406_p10 = pnand %p1405_p9, %p1404_p8  ;;  %p1411_p2 = por %p1410_p0, %p1409_p11 }
  0x37   : > { %p1407_p13 = pneg %p1406_p10 }
  0x39   : > { %p1412_p4 = pnand %p1411_p2, %p1407_p13 }
  0x3b   : > { %1415 = shalt.err (!%p1412_p4)
}
  0x3c   : > { %1198 = dma.hbm_to_vmem [thread:$0]  (!%p1697_p7), %s323_s24, 128, %s325_s23, %s313_s1  }
  0x3d   : > { %333 = sbr.rel (%p1625_p3) target bundleno = 1560 (0x618), region = 48  ;;  %s1714_s9 = sand.u32 (!%p1625_p3), 1, %s1529_s28  }
  0x3e   : > { %s1717_s18 = sshll.u32 (!%p1625_p3), %s1714_s9, 3  ;;  %s336_s3 = scalar_lea.sflag (!%p1625_p3), [#allocation3], %s1714_s9 }
  0x3f   : > { %s339_s4 = scalar_lea.vmem (!%p1625_p3), [#allocation2], %s1717_s18 }
  0x42   : > { %1504 = dma.done.wait (%p1676_p12), %s336_s3, 128  }
  0x43   : > { %1506 = vsyncadd (%p1676_p12), %s336_s3, 4294967168 }
  0x44   : > { %1508 = dma.done.wait (%p51_p1), [#allocation6], 1552  }
  0x45   : > { %1510 = vsyncadd (%p51_p1), [#allocation6], 4294965744 }
  0x46   : > { %1512 = dma.done.wait (%p51_p1), [#allocation9], 608  }
  0x47   : > { %1514 = vsyncadd (%p51_p1), [#allocation9], 4294966688  ;;  %vm400_vm0 = vcmask 261120   ;;  %v1733_v0 = vld [vmem:[%s339_s4] sm:$0xff]  ;;  %v1547_v2 = vmov 32.0   ;;  %v1144_v17 = vld [vmem:[#allocation7] sm:$0xff] }
  0x48   : > { %v401_v1 = vsel %vm400_vm0, %v1733_v0, 0.0  ;;  %1269 = vrcp.f32 %v1547_v2  ;;  %v1145_v14 = vld [vmem:[#allocation7 + $0x8] sm:$0xff]  ;;  %v1146_v18 = vld [vmem:[#allocation7 + $0x20] sm:$0xff]  ;;  %v1153_v21 = vld [vmem:[#allocation7 + $0x18] sm:$0xff]  ;;  %vm601_vm5 = vcmask 1043456   ;;  %vm570_vm6 = vcmask 64512  }
  0x49   : > { %402 = vadd.xlane.f32.xlu0 %v401_v1  ;;  %v1147_v15 = vld [vmem:[#allocation7 + $0x28] sm:$0xff]  ;;  %470 = vmatpush.bf16.msra.mxu0 %v1145_v14  ;;  %v1148_v19 = vld [vmem:[#allocation7 + $0x40] sm:$0xff]  ;;  %v1155_v22 = vld [vmem:[#allocation7 + $0x38] sm:$0xff]  ;;  %vm596_vm11 = vcmask 60416   ;;  %s1756_s19 = scalar_lea.vmem [#allocation12], %s1717_s18  ;;  %s1141_s20 = sshll.u32 %s1620_s12, 2 }
  0x4a   : > { %v1149_v16 = vld [vmem:[#allocation7 + $0x48] sm:$0xff]  ;;  %505 = vmatpush.bf16.msra.mxu1 %v1147_v15  ;;  %v1152_v24 = vld [vmem:[#allocation7 + $0x10] sm:$0xff]  ;;  %v1260_v33 = vld [vmem:[#allocation5] ss:$0 sm:$0xff]  ;;  %s896_s21 = scalar_lea.hbm %s1835_s8, %s1141_s20  ;;  %s897_s14 = sshll.u32 %s1756_s19, 4  ;;  %s898_s14 = int_to_ptr.vmem [resolvable:$true] %s897_s14 }
  0x4b   : > { %540 = vmatpush.bf16.msra.mxu2 %v1149_v16  ;;  %v1154_v25 = vld [vmem:[#allocation7 + $0x30] sm:$0xff]  ;;  %v1261_v35 = vld [vmem:[%s1829_s2] ss:$0 sm:$0xff]  ;;  %v1263_v40 = vld [vmem:[#allocation8 + $0x2] ss:$0 sm:$0xff]  ;;  %s899_s15 = sshll.u32 %s896_s21, 4  ;;  %s900_s15 = int_to_ptr.hbm [resolvable:$true] %s899_s15 }
  0x4c   : > { %v1262_v44 = vld [vmem:[#allocation8] ss:$0 sm:$0xff]  ;;  %v1157_v46 = vld [vmem:[#allocation7 + $0x58] sm:$0xff]  ;;  %v1264_v47 = vld [vmem:[#allocation8 + $0x4] ss:$0 sm:$0xff]  ;;  %s872_s16 = scalar_lea.sflag [#allocation13], %s1714_s9 }
  0x4d   : > { %471 = vmatpush.bf16.msra.mxu0 %v1144_v17  ;;  %v1156_v51 = vld [vmem:[#allocation7 + $0x50] sm:$0xff]  ;;  %v1266_v60 = vld [vmem:[#allocation8 + $0x3] ss:$0 sm:$0xff]  ;;  %s1445_s17 = sshra.s32 %s900_s15, 4  ;;  %s1451_s1 = scalar_lea.hbm %s1835_s8, 16  ;;  %s1446_s17 = int_to_ptr.hbm [resolvable:$true] %s1445_s17 }
  0x4e   : > { %v1270_v3 = vpop.eup %1269  ;;  %506 = vmatpush.bf16.msra.mxu1 %v1146_v18  ;;  %s1447_s26 = scalar_lea.hbm %s1446_s17, 8  ;;  %p1452_p12 = scmp.lt.s32.totalorder %s1446_s17, %s1835_s8 }
  0x4f   : > { %v405_v4 = vmul.f32 32.0, %v1270_v3  ;;  %vm409_vm1 = vweird.f32 %v1270_v3  ;;  %541 = vmatpush.bf16.msra.mxu2 %v1148_v19  ;;  %p1448_p1 = scmp.ne.s32.totalorder %s1446_s17, %s1447_s26  ;;  %p1453_p7 = scmp.lt.s32.totalorder %s1451_s1, %s1447_s26 }
  0x51   : > { %v406_v5 = vsub.f32 1.0, %v405_v4  ;;  %p1449_p3 = pnand %p1448_p1, %p1683_p5  ;;  %p1454_p8 = por %p1453_p7, %p1452_p12 }
  0x52   : > { %651 = vmatpush.bf16.msrb.mxu1 %v1153_v21 }
  0x53   : > { %v407_v6 = vmul.f32 %v1270_v3, %v406_v5  ;;  %686 = vmatpush.bf16.msrb.mxu2 %v1155_v22  ;;  %p1450_p4 = pneg %p1449_p3 }
  0x55   : > { %v408_v7 = vadd.f32 %v1270_v3, %v407_v6  ;;  %p1455_p9 = pnand %p1454_p8, %p1450_p4 }
  0x56   : > { %652 = vmatpush.bf16.msrb.mxu1 %v1152_v24 }
  0x57   : > { %v410_v8 = vsel %vm409_vm1, %v1270_v3, %v408_v7  ;;  %687 = vmatpush.bf16.msrb.mxu2 %v1154_v25 }
  0xbc   : > { %v403_v9 = vpop.xlane.xlu0 %402 }
  0xbd   : > { %v411_v10 = vmul.f32 %v410_v8, %v403_v9 }
  0xbf   : > { %v412_v11 = vsub.f32 %v1733_v0, %v411_v10 }
  0xc1   : > { %v413_v12 = vmul.f32 %v412_v11, %v412_v11 }
  0xc3   : > { %v414_v13 = vsel %vm400_vm0, %v413_v12, 0.0 }
  0xc4   : > { %415 = vadd.xlane.f32.xlu0 %v414_v13 }
 0x137   : > { %v416_v20 = vpop.xlane.xlu0 %415 }
 0x138   : > { %v417_v23 = vmul.f32 %v416_v20, %v410_v8  ;;  %v1267_v8 = vld [vmem:[#allocation8 + $0x5] ss:$0 sm:$0xff]  ;;  %v1151_v20 = vld [vmem:[#allocation10 + $0x8] sm:$0xff] }
 0x13a   : > { %v418_v26 = vadd.f32 1e-05, %v417_v23 }
 0x13c   : > { %1271 = vrsqrt.f32 %v418_v26  ;;  %vm425_vm3 = vweird.f32 %v418_v26 }
 0x142   : > { %v1272_v27 = vpop.eup %1271 }
 0x143   : > { %v420_v28 = vmul.f32 %v1272_v27, %v418_v26  ;;  %vm426_vm2 = vweird.f32 %v1272_v27 }
 0x144   : > { %vm427_vm4 = vmor %vm425_vm3, %vm426_vm2 }
 0x145   : > { %v421_v29 = vmul.f32 %v1272_v27, %v420_v28 }
 0x147   : > { %v422_v30 = vmul.f32 0.5, %v421_v29 }
 0x149   : > { %v423_v31 = vsub.f32 1.5, %v422_v30 }
 0x14b   : > { %v424_v32 = vmul.f32 %v1272_v27, %v423_v31 }
 0x14d   : > { %v428_v34 = vsel %vm427_vm4, %v1272_v27, %v424_v32 }
 0x14e   : > { %v429_v36 = vmul.f32 %v428_v34, %v412_v11 }
 0x150   : > { %v434_v37 = vmul.f32 %v1260_v33, %v429_v36  ;;  %v1265_v33 = vld [vmem:[#allocation8 + $0x1] ss:$0 sm:$0xff]  ;;  %v1150_v36 = vld [vmem:[#allocation10] sm:$0xff] }
 0x152   : > { %v439_v38 = vadd.f32 %v1261_v35, %v434_v37 }
 0x154   : > { %v440_v39 = vpack.c.bf16 %v439_v38, %v439_v38 }
 0x156   : > { %1069 = vmatmul.msk.bf16.vlgmr.msra.gmra.mxu0 %vm400_vm0, %v440_v39  ;;  %1078 = vmatmul.msk.bf16.vlgmr.msra.gmra.mxu1 %vm400_vm0, %v440_v39 }
 0x157   : > { %1087 = vmatmul.msk.bf16.vlgmr.msra.gmra.mxu2 %vm400_vm0, %v440_v39 }
 0x166   : > { %1098 = vmatmul.msk.bf16.vlgmr.msrb.gmra.mxu1 %vm400_vm0, %v440_v39 }
 0x167   : > { %1107 = vmatmul.msk.bf16.vlgmr.msrb.gmra.mxu2 %vm400_vm0, %v440_v39 }
 0x1d3   : > { %v473_v41 = vpop.f32.mrf.mxu0  ;;  %v508_v42 = vpop.f32.mrf.mxu1 }
 0x1d4   : > { %v509_v43 = vadd.f32 %v1263_v40, %v508_v42  ;;  %v474_v49 = vadd.f32 %v1262_v44, %v473_v41 }
 0x1d6   : > { %v548_v45 = vpack.c.bf16 %v509_v43, %v509_v43  ;;  %v547_v56 = vpack.c.bf16 %v474_v49, %v474_v49 }
 0x1d8   : > { %v554_v48 = vsel %vm400_vm0, %v548_v45, 0 }
 0x1d9   : > { %563 = vmatpush.bf16.xpose.msra.mxu3 %v554_v48 }
 0x1da   : > { %v543_v50 = vpop.f32.mrf.mxu2 }
 0x1db   : > { %v544_v52 = vadd.f32 %v1264_v47, %v543_v50  ;;  %v475_v53 = vpop.f32.mrf.mxu0  ;;  %v510_v54 = vpop.f32.mrf.mxu1 }
 0x1dd   : > { %v549_v55 = vpack.c.bf16 %v544_v52, %v544_v52  ;;  %v1158_v52 = vld [vmem:[#allocation10 + $0x10] sm:$0xff] }
 0x1df   : > { %v603_v57 = vsel %vm601_vm5, %v549_v55, 0 }
 0x1e0   : > { %612 = vmatpush.bf16.msrb.mxu0 %v603_v57  ;;  %1088 = vmatmul.msk.bf16.vlgmr.msra.gmra.mxu3 %vm400_vm0, %v547_v56 }
 0x1e1   : > { %721 = vmatpush.bf16.msrb.mxu3 %v1157_v46 }
 0x1e2   : > { %v545_v58 = vpop.f32.mrf.mxu2 }
 0x1e3   : > { %v654_v59 = vpop.f32.mrf.mxu1 }
 0x1e4   : > { %v655_v34 = vadd.f32 %v1265_v33, %v654_v59 }
 0x1e5   : > { %722 = vmatpush.bf16.msrb.mxu3 %v1156_v51  ;;  %v1159_v51 = vld [vmem:[#allocation10 + $0x18] sm:$0xff] }
 0x1e6   : > { %v728_v35 = vpack.c.bf16 %v655_v34, %v655_v34  ;;  %824 = vmatpush.bf16.msra.mxu2 %v1159_v51 }
 0x1e9   : > { %852 = vmatpush.bf16.msra.mxu3 %v1151_v20 }
 0x1ea   : > { %v689_v61 = vpop.f32.mrf.mxu2  ;;  %825 = vmatpush.bf16.msra.mxu2 %v1158_v52 }
 0x1eb   : > { %v690_v62 = vadd.f32 %v1266_v60, %v689_v61  ;;  %v656_v63 = vpop.f32.mrf.mxu1 }
 0x1ed   : > { %v729_v1 = vpack.c.bf16 %v690_v62, %v690_v62  ;;  %853 = vmatpush.bf16.msra.mxu3 %v1150_v36 }
 0x1ef   : > { %v735_v2 = vsel %vm400_vm0, %v729_v1, 0 }
 0x1f0   : > { %744 = vmatpush.bf16.xpose.msra.mxu0 %v735_v2  ;;  %1116 = vmatmul.msk.bf16.vlgmr.msrb.gmra.mxu3 %vm400_vm0, %v440_v39 }
 0x1f2   : > { %v691_v3 = vpop.f32.mrf.mxu2 }
 0x263   : > { %v565_v4 = vpop.f32.mrf.mxu3 }
 0x264   : > { %v569_v5 = vmul.f32 0.17677669, %v565_v4 }
 0x266   : > { %v571_v6 = vsel %vm570_vm6, %v569_v5, -inf }
 0x267   : > { %572 = vmax.xlane.f32.xlu1 %v571_v6 }
 0x26b   : > { %v567_v7 = vpop.f32.mrf.mxu3 }
 0x273   : > { %v724_v9 = vpop.f32.mrf.mxu3 }
 0x274   : > { %v725_v10 = vadd.f32 %v1267_v8, %v724_v9 }
 0x276   : > { %v730_v11 = vpack.c.bf16 %v725_v10, %v725_v10 }
 0x278   : > { %v782_v12 = vsel %vm601_vm5, %v730_v11, 0 }
 0x279   : > { %791 = vmatpush.bf16.msra.mxu1 %v782_v12 }
 0x27b   : > { %v726_v13 = vpop.f32.mrf.mxu3 }
 0x2da   : > { %v573_v14 = vpop.xlane.xlu1 %572 }
 0x2db   : > { %v574_v15 = vsub.f32 %v569_v5, %v573_v14 }
 0x2dd   : > { %v575_v16 = vmul.f32 1.442695, %v574_v15 }
 0x2df   : > { %1273 = vpow2.f32 %v575_v16 }
 0x2e5   : > { %v1274_v17 = vpop.eup %1273 }
 0x2e6   : > { %v577_v18 = vsel %vm570_vm6, %v1274_v17, 0.0 }
 0x2e7   : > { %578 = vadd.xlane.f32.xlu1 %v577_v18 }
 0x35a   : > { %v579_v19 = vpop.xlane.xlu1 %578 }
 0x35b   : > { %1275 = vrcp.f32 %v579_v19  ;;  %v591_v24 = vand.u32 2147483648, %v579_v19  ;;  %v589_v26 = vand.u32 2147483647, %v579_v19  ;;  %vm585_vm8 = vweird.f32 %v579_v19 }
 0x35d   : > { %v592_v28 = vor.u32 1.1754944e-38, %v591_v24  ;;  %vm590_vm10 = vcmp.eq.f32.partialorder %v589_v26, 8.507059e+37 }
 0x361   : > { %v1276_v21 = vpop.eup %1275 }
 0x362   : > { %v581_v22 = vmul.f32 %v1276_v21, %v579_v19  ;;  %vm586_vm7 = vweird.f32 %v1276_v21 }
 0x363   : > { %vm587_vm9 = vmor %vm585_vm8, %vm586_vm7 }
 0x364   : > { %v582_v23 = vsub.f32 1.0, %v581_v22 }
 0x366   : > { %v583_v25 = vmul.f32 %v1276_v21, %v582_v23 }
 0x368   : > { %v584_v27 = vadd.f32 %v1276_v21, %v583_v25 }
 0x36a   : > { %v588_v29 = vsel %vm587_vm9, %v1276_v21, %v584_v27 }
 0x36b   : > { %v593_v30 = vsel %vm590_vm10, %v592_v28, %v588_v29 }
 0x36c   : > { %v594_v31 = vmul.f32 %v1274_v17, %v593_v30 }
 0x36e   : > { %v595_v32 = vpack.c.bf16 %v594_v31, %v594_v31 }
 0x370   : > { %597 = vst.msk [vmem:[%s1756_s19] sm:$0xf] %vm596_vm11, %v595_v32  ;;  %1089 = vmatmul.msk.bf16.vlgmr.msrb.gmra.mxu0 %vm570_vm6, %v595_v32 }
 0x380   : > { %1117 = vmatmul.msk.bf16.vlgmr.msra.gmra.mxu0 %vm400_vm0, %v728_v35 }
 0x3ed   : > { %v614_v37 = vpop.f32.mrf.mxu0 }
 0x3ee   : > { %v618_v38 = vpack.c.bf16 %v614_v37, %v614_v37 }
 0x3f0   : > { %1137 = vmatmul.msk.bf16.vlgmr.msra.gmra.mxu3 %vm400_vm0, %v618_v38 }
 0x3f5   : > { %v616_v39 = vpop.f32.mrf.mxu0 }
 0x3fd   : > { %v746_v40 = vpop.f32.mrf.mxu0 }
 0x3fe   : > { %v750_v41 = vmul.f32 0.17677669, %v746_v40 }
 0x400   : > { %v751_v42 = vsel %vm570_vm6, %v750_v41, -inf }
 0x401   : > { %752 = vmax.xlane.f32.xlu2 %v751_v42 }
 0x405   : > { %v748_v43 = vpop.f32.mrf.mxu0 }
 0x473   : > { %v1764_v44 = vpop.f32.mrf.mxu3 }
 0x474   : > { %v753_v45 = vpop.xlane.xlu2 %752 }
 0x475   : > { %v754_v46 = vsub.f32 %v750_v41, %v753_v45 }
 0x477   : > { %v755_v47 = vmul.f32 1.442695, %v754_v46 }
 0x479   : > { %1277 = vpow2.f32 %v755_v47 }
 0x47b   : > { %v857_v48 = vpop.f32.mrf.mxu3 }
 0x47f   : > { %v1278_v49 = vpop.eup %1277 }
 0x480   : > { %v757_v50 = vsel %vm570_vm6, %v1278_v49, 0.0 }
 0x481   : > { %758 = vadd.xlane.f32.xlu2 %v757_v50 }
 0x4f4   : > { %v759_v53 = vpop.xlane.xlu2 %758 }
 0x4f5   : > { %1279 = vrcp.f32 %v759_v53  ;;  %v771_v57 = vand.u32 2147483648, %v759_v53  ;;  %v769_v59 = vand.u32 2147483647, %v759_v53  ;;  %vm765_vm13 = vweird.f32 %v759_v53 }
 0x4f7   : > { %v772_v61 = vor.u32 1.1754944e-38, %v771_v57  ;;  %vm770_vm15 = vcmp.eq.f32.partialorder %v769_v59, 8.507059e+37 }
 0x4fb   : > { %v1280_v54 = vpop.eup %1279 }
 0x4fc   : > { %v761_v55 = vmul.f32 %v1280_v54, %v759_v53  ;;  %vm766_vm12 = vweird.f32 %v1280_v54 }
 0x4fd   : > { %vm767_vm14 = vmor %vm765_vm13, %vm766_vm12 }
 0x4fe   : > { %v762_v56 = vsub.f32 1.0, %v761_v55 }
 0x500   : > { %v763_v58 = vmul.f32 %v1280_v54, %v762_v56 }
 0x502   : > { %v764_v60 = vadd.f32 %v1280_v54, %v763_v58 }
 0x504   : > { %v768_v62 = vsel %vm767_vm14, %v1280_v54, %v764_v60 }
 0x505   : > { %v773_v63 = vsel %vm770_vm15, %v772_v61, %v768_v62 }
 0x506   : > { %v774_v1 = vmul.f32 %v1278_v49, %v773_v63 }
 0x508   : > { %v775_v2 = vpack.c.bf16 %v774_v1, %v774_v1 }
 0x50a   : > { %1118 = vst.msk [vmem:[%s1756_s19 + $0x4] sm:$0xf] %vm596_vm11, %v775_v2  ;;  %1119 = vmatmul.msk.bf16.vlgmr.msra.gmra.mxu1 %vm570_vm6, %v775_v2 }
 0x587   : > { %v793_v3 = vpop.f32.mrf.mxu1 }
 0x588   : > { %v797_v4 = vpack.c.bf16 %v793_v3, %v793_v3 }
 0x58a   : > { %1128 = vmatmul.msk.bf16.vlgmr.msra.gmra.mxu2 %vm400_vm0, %v797_v4 }
 0x58f   : > { %v795_v5 = vpop.f32.mrf.mxu1 }
 0x590   : > { %1458 = shalt.err (!%p1455_p9)
}
 0x591   : > { %s1548_s19 = smov 64   ;;  %s1549_s20 = smov 128   ;;  %v1268_v6 = vld [vmem:[%s1833_s6] ss:$0 sm:$0xff] }
 0x592   : > { %s1550_s23 = smov 4   ;;  %s1140_s24 = sshll.u32 %s1620_s12, 3 }
 0x593   : > { %1179 = dma.vmem_to_hbm [thread:$0]  (%p1683_p5), %s898_s14, 128, %s900_s15, %s872_s16, %s1548_s19, %s1549_s20, %s1550_s23  }
 0x594   : > { %s882_s26 = scalar_lea.hbm %s1834_s7, %s1140_s24  ;;  %s390_s4 = scalar_lea.vmem [#allocation11], %s1717_s18 }
 0x595   : > { %s884_s1 = sshll.u32 %s390_s4, 4  ;;  %s886_s13 = sshll.u32 %s882_s26, 4  ;;  %s885_s1 = int_to_ptr.vmem [resolvable:$true] %s884_s1  ;;  %s887_s13 = int_to_ptr.hbm [resolvable:$true] %s886_s13 }
 0x596   : > { %s867_s12 = scalar_lea.sflag [#allocation4], %s1714_s9  ;;  %s1473_s14 = sshra.s32 %s887_s13, 4  ;;  %s1474_s14 = int_to_ptr.hbm [resolvable:$true] %s1473_s14 }
 0x597   : > { %s1475_s15 = scalar_lea.hbm %s1474_s14, 8  ;;  %s1479_s19 = scalar_lea.hbm %s1834_s7, 16 }
 0x598   : > { %p1476_p10 = scmp.ne.s32.totalorder %s1474_s14, %s1475_s15  ;;  %p1480_p0 = scmp.lt.s32.totalorder %s1474_s14, %s1834_s7 }
 0x599   : > { %p1481_p2 = scmp.lt.s32.totalorder %s1479_s19, %s1475_s15 }
 0x59a   : > { %p1477_p13 = pnand %p1476_p10, %p1683_p5 }
 0x59b   : > { %p1482_p1 = por %p1481_p2, %p1480_p0 }
 0x59c   : > { %p1478_p11 = pneg %p1477_p13 }
 0x59e   : > { %p1483_p3 = pnand %p1482_p1, %p1478_p11 }
 0x60d   : > { %v827_v7 = vpop.f32.mrf.mxu2 }
 0x60e   : > { %v856_v8 = vadd.f32 %v1764_v44, %v827_v7 }
 0x610   : > { %v863_v9 = vadd.f32 %v1268_v6, %v856_v8 }
 0x612   : > { %v864_v10 = vadd.f32 %v863_v9, %v1733_v0 }
 0x614   : > { %865 = vst.msk [vmem:[%s390_s4] sm:$0xff] %vm400_vm0, %v864_v10 }
 0x615   : > { %v829_v11 = vpop.f32.mrf.mxu2 }
 0x616   : > { %1486 = shalt.err (!%p1483_p3)
}
 0x617   : > { %1178 = dma.vmem_to_hbm [thread:$0]  (%p1683_p5), %s885_s1, 128, %s887_s13, %s867_s12  }
 0x618 PF: > { %s914_s9 = sand.u32 1, %s1525_s27   ;;  %p1851_p4 = scmp.ge.s32.totalorder %s1537_s30, 2 }
 0x619   : > { %s915_s24 = scalar_lea.sflag [#allocation4], %s914_s9 }
 0x61a   : > { %p1200_p12 = pnand %p1851_p4, %p1687_p6 }
 0x61c   : > { %p1201_p7 = pneg %p1200_p12 }
 0x61e   : > { %1516 = dma.done.wait (%p1201_p7), %s915_s24, 128  }
 0x61f   : > { %1518 = vsyncadd (%p1201_p7), %s915_s24, 4294967168  ;;  %s925_s21 = scalar_lea.sflag [#allocation13], %s914_s9 }
 0x620   : > { %1520 = dma.done.wait (%p1201_p7), %s925_s21, 128  }
 0x621   : > { %1522 = vsyncadd (%p1201_p7), %s925_s21, 4294967168  ;;  %p27_p5 = scmp.ge.s32.totalorder %s1657_s22, 4   ;;  %s1852_s27 = smov %s1529_s28 }
 0x622   : > { %s1853_s28 = smov %s1533_s29  ;;  %s1854_s29 = smov %s1668_s25 }
 0x623   : > { %s1855_s30 = smov %s1657_s22  ;;  %29 = sbr.rel (!%p27_p5) target bundleno = 14 (0xe), region = 138 }
 0x628   :  { %931 = vsyncpa [#allocation3], 1 }
 0x629   :  { %933 = vsyncpa [#allocation3 + $0x1], 1 }
 0x62a   :  { %934 = vsyncpa [#allocation6], 1 }
 0x62b   :  { %935 = vsyncpa [#allocation9], 1 }
 0x62c   :  { %936 = vsyncpa [#allocation4], 1 }
 0x62d   :  { %938 = vsyncpa [#allocation4 + $0x1], 1 }
 0x62e   :  { %939 = vsyncpa [#allocation13], 1 }
 0x62f   :  { %941 = vsyncpa [#allocation13 + $0x1], 1 }

</bundles_post_ra>
